<compile_context>
chip_gen: v6e
topology: v6e:2x2x1
jax: 0.10.0
libtpu: 0.0.40
codegen_flags: <defaults>
</compile_context>

<pallas_src>
import math
import functools

import jax
import jax.numpy as jnp
from jax.experimental import pallas as pl
from jax.experimental.pallas import tpu as pltpu


def _mhatt_kernel(q_ref, k_ref, v_ref, maskb_ref,
                  wq_ref, bq_ref, wk_ref, bk_ref, wv_ref, bv_ref,
                  wm_ref, bm_ref,
                  o_ref,
                  kh_scratch, vh_scratch,
                  *, num_heads: int, compute_dtype, exp_dtype,
                  approx_recip: bool, block_k: int):
    # Per-grid-step shapes:
    #   q_ref: (1, block_q, H)   k_ref/v_ref: (1, Sk, H)
    #   maskb_ref: (1, 1, Sk) f32 additive bias   weights: (H, H) (in, out)
    #   biases: (1, H) f32   o_ref: (1, block_q, H)
    #   kh_scratch/vh_scratch: (nH, Sk, dk) compute dtype (carried per batch)
    f32 = jnp.float32
    cdt = compute_dtype
    nH = num_heads

    bq_rows = q_ref.shape[1]
    H = q_ref.shape[2]
    Sk = k_ref.shape[1]
    dk = H // nH

    # ---- Project + head-split K and V once per batch index (q-tile == 0) ----
    @pl.when(pl.program_id(1) == 0)
    def _():
        k = k_ref[0]                                              # (Sk, H)
        v = v_ref[0]                                              # (Sk, H)
        kp = jnp.dot(k, wk_ref[...], preferred_element_type=f32) + bk_ref[0]
        vp = jnp.dot(v, wv_ref[...], preferred_element_type=f32) + bv_ref[0]
        kh_scratch[...] = kp.astype(cdt).reshape(Sk, nH, dk).transpose(1, 0, 2)
        vh_scratch[...] = vp.astype(cdt).reshape(Sk, nH, dk).transpose(1, 0, 2)

    # ---- Q projection for this q-tile (scale 1/sqrt(dk) folded into wq/bq) --
    q = q_ref[0]                                                  # (bq, H)
    qp = jnp.dot(q, wq_ref[...], preferred_element_type=f32) + bq_ref[0]
    qh = qp.astype(cdt).reshape(bq_rows, nH, dk).transpose(1, 0, 2)  # (nH,bq,dk)

    mask_bias = maskb_ref[0]                                      # (1, Sk) f32

    # ---- Flash-style online softmax over Sk chunks ---------------------------
    num_chunks = (Sk + block_k - 1) // block_k
    m_i = None
    l_i = None
    acc = None
    for ci in range(num_chunks):
        start = ci * block_k
        size = min(block_k, Sk - start)
        kh = kh_scratch[:, start:start + size, :]                 # (nH, bk, dk)
        vh = vh_scratch[:, start:start + size, :]                 # (nH, bk, dk)
        mb = mask_bias[:, start:start + size]                     # (1, bk)

        s = jnp.einsum('hqd,hkd->hqk', qh, kh,
                       preferred_element_type=f32)                # (nH, bq, bk)
        s = s + mb[None, :, :]

        if ci == 0:
            m_i = jnp.max(s, axis=-1, keepdims=True)
            p = jnp.exp((s - m_i).astype(exp_dtype))
            l_i = jnp.sum(p.astype(f32), axis=-1, keepdims=True)
            acc = jnp.einsum('hqk,hkd->hqd', p.astype(cdt), vh,
                             preferred_element_type=f32)
        else:
            m_new = jnp.maximum(m_i, jnp.max(s, axis=-1, keepdims=True))
            alpha = jnp.exp(m_i - m_new)                          # (nH, bq, 1)
            p = jnp.exp((s - m_new).astype(exp_dtype))
            l_i = alpha * l_i + jnp.sum(p.astype(f32), axis=-1, keepdims=True)
            acc = alpha * acc + jnp.einsum('hqk,hkd->hqd', p.astype(cdt), vh,
                                           preferred_element_type=f32)
            m_i = m_new

    # Deferred normalization on the small (nH, bq, dk) accumulator.
    out = acc * pl.reciprocal(l_i, approx=approx_recip)

    # (Dropout == identity in eval mode.)

    # Merge heads + output projection (weight pre-transposed to (in, out)).
    out = out.astype(cdt).transpose(1, 0, 2).reshape(bq_rows, H)
    merged = jnp.dot(out, wm_ref[...], preferred_element_type=f32) + bm_ref[0]
    o_ref[0] = merged.astype(o_ref.dtype)


def mhatt_forward(v, k, q, mask, params, *, num_heads,
                  compute_dtype=jnp.bfloat16, block_q=None, block_k=512):
    """v, k, q: (B, S, H); mask: (B, 1, Sk) float (1.0 = masked position)."""
    B, Sq, H = q.shape
    Sk = k.shape[1]
    assert H % num_heads == 0
    dk = H // num_heads
    out_dtype = q.dtype
    cdt = jnp.dtype(compute_dtype)
    f32 = jnp.float32

    # --- generation-aware knobs ----------------------------------------------
    try:
        device_kind = jax.devices()[0].device_kind.lower()
    except Exception:  # pragma: no cover - defensive
        device_kind = ""
    is_v5 = "v5" in device_kind
    try:
        vmem_cap = int(pltpu.get_tpu_info().vmem_capacity_bytes)
    except Exception:  # pragma: no cover - defensive
        vmem_cap = 128 * 1024 * 1024
    # ~0.6 of physical VMEM, clamped to [32 MiB, 64 MiB]: ~38 MiB on v7x
    # (64 MiB/TC), 64 MiB on v5e/v6e (128 MiB).
    vmem_limit = int(min(64 * 1024 * 1024,
                         max(32 * 1024 * 1024, (vmem_cap * 3) // 5)))

    if block_q is None:
        block_q = 128 if is_v5 else 256      # 4x128^2 MXU gains nothing from 256
    block_q = min(block_q, Sq)
    block_k = min(block_k, Sk)
    nq = pl.cdiv(Sq, block_q)
    num_k_chunks = (Sk + block_k - 1) // block_k

    # bf16 exp hits the bf16 EUP on v6e/v7x; keep f32 exp on v5e and on the
    # reference-fidelity f32 path.
    exp_dtype = f32 if (cdt == jnp.dtype(jnp.float32) or is_v5) else cdt
    approx_recip = cdt != jnp.dtype(jnp.float32)

    # --- wrapper-side layout plumbing (zero per-step cost) --------------------
    inv_sqrt_dk = 1.0 / math.sqrt(dk)
    # PyTorch nn.Linear weight is (out, in); store W^T = (in, out) so the
    # kernel does a plain x @ W.  Fold 1/sqrt(dk) into the Q projection.
    wqT = (params['wq'].astype(f32) * inv_sqrt_dk).T.astype(cdt)
    wkT = params['wk'].T.astype(cdt)
    wvT = params['wv'].T.astype(cdt)
    wmT = params['wm'].T.astype(cdt)
    bq = (params['bq'].astype(f32) * inv_sqrt_dk)
    bk = params['bk'].astype(f32)
    bv = params['bv'].astype(f32)
    bm = params['bm'].astype(f32)

    # Additive mask bias: -1e9 at masked positions, 0 elsewhere.
    mask_bias = mask.astype(f32) * jnp.float32(-1.0e9)

    qc = q.astype(cdt)
    kc = k.astype(cdt)
    vc = v.astype(cdt)

    # --- cost estimate (K/V projections now run once per batch) ---------------
    flops = int(
        2 * B * Sq * H * H                      # Q projection
        + 2 * 2 * B * Sk * H * H                # K and V projections (per batch)
        + 2 * B * Sq * H * H                    # merge projection
        + 2 * 2 * B * num_heads * Sq * Sk * dk  # QK^T and att@V
    )
    transcendentals = int(B * num_heads * Sq * (Sk + num_k_chunks))
    bytes_accessed = int(
        (B * Sq * H + 2 * B * Sk * H) * cdt.itemsize   # q, k, v
        + B * Sk * 4                                   # mask bias
        + 4 * H * H * cdt.itemsize                     # weights
        + 4 * H * 4                                    # biases
        + B * Sq * H * jnp.dtype(out_dtype).itemsize   # output
    )

    kernel = functools.partial(
        _mhatt_kernel,
        num_heads=num_heads,
        compute_dtype=cdt,
        exp_dtype=exp_dtype,
        approx_recip=approx_recip,
        block_k=block_k,
    )

    def build(single_buffer_invariants: bool):
        # Weights / biases never change block index -> single-buffer them to
        # reclaim VMEM (4 HxH double-buffered weights are the biggest dead cost).
        inv_kw = ({'pipeline_mode': pl.Buffered(1)}
                  if single_buffer_invariants else {})
        q_spec = pl.BlockSpec((1, block_q, H), lambda b, s: (b, s, 0))
        kv_spec = pl.BlockSpec((1, Sk, H), lambda b, s: (b, 0, 0))
        mask_spec = pl.BlockSpec((1, 1, Sk), lambda b, s: (b, 0, 0))
        w_spec = pl.BlockSpec((H, H), lambda b, s: (0, 0), **inv_kw)
        b_spec = pl.BlockSpec((1, H), lambda b, s: (0, 0), **inv_kw)
        out_spec = pl.BlockSpec((1, block_q, H), lambda b, s: (b, s, 0))

        return pl.pallas_call(
            kernel,
            out_shape=jax.ShapeDtypeStruct((B, Sq, H), out_dtype),
            grid_spec=pltpu.PrefetchScalarGridSpec(
                num_scalar_prefetch=0,
                grid=(B, nq),
                in_specs=[q_spec, kv_spec, kv_spec, mask_spec,
                          w_spec, b_spec, w_spec, b_spec, w_spec, b_spec,
                          w_spec, b_spec],
                out_specs=out_spec,
                scratch_shapes=[
                    pltpu.VMEM((num_heads, Sk, dk), cdt),   # projected K heads
                    pltpu.VMEM((num_heads, Sk, dk), cdt),   # projected V heads
                ],
            ),
            compiler_params=pltpu.CompilerParams(
                # q-tile axis must be "arbitrary": the projected-KV scratch is
                # carried across it (recomputed only when the batch index moves).
                dimension_semantics=("parallel", "arbitrary"),
                vmem_limit_bytes=vmem_limit,
            ),
            cost_estimate=pl.CostEstimate(
                flops=flops,
                transcendentals=transcendentals,
                bytes_accessed=bytes_accessed,
            ),
        )

    args = (qc, kc, vc, mask_bias, wqT, bq, wkT, bk, wvT, bv, wmT, bm)
    try:
        return build(True)(*args)
    except Exception:
        # Fallback for JAX builds where BlockSpec(pipeline_mode=...) is not
        # accepted by the TPU pipeline; identical kernel, default buffering.
        return build(False)(*args)


def _reference(v, k, q, mask, params, num_heads):
    """Pure-JAX reference matching the PyTorch forward (eval mode)."""
    B, Sq, H = q.shape
    Sk = k.shape[1]
    dk = H // num_heads

    def lin(x, w, b):
        return x @ w.T + b[0]

    qp = lin(q, params['wq'], params['bq']).reshape(B, Sq, num_heads, dk).transpose(0, 2, 1, 3)
    kp = lin(k, params['wk'], params['bk']).reshape(B, Sk, num_heads, dk).transpose(0, 2, 1, 3)
    vp = lin(v, params['wv'], params['bv']).reshape(B, Sk, num_heads, dk).transpose(0, 2, 1, 3)

    scores = jnp.einsum('bhqd,bhkd->bhqk', qp, kp) / math.sqrt(dk)
    m = mask[:, None, :, :] > 0.5                      # (B,1,1,Sk)
    scores = jnp.where(m, -1000000000.0, scores)
    att = jax.nn.softmax(scores, axis=-1)
    out = jnp.einsum('bhqk,bhkd->bhqd', att, vp)
    out = out.transpose(0, 2, 1, 3).reshape(B, Sq, H)
    return lin(out, params['wm'], params['bm'])


if __name__ == "__main__":
    B, S, H, NH = 2, 8, 32, 4   # batch, seq, hidden_size, multi_head

    key = jax.random.PRNGKey(0)
    keys = jax.random.split(key, 12)

    scale = 1.0 / math.sqrt(H)
    params = {
        'wq': jax.random.normal(keys[0], (H, H), jnp.float32) * scale,
        'bq': jax.random.normal(keys[1], (1, H), jnp.float32) * 0.01,
        'wk': jax.random.normal(keys[2], (H, H), jnp.float32) * scale,
        'bk': jax.random.normal(keys[3], (1, H), jnp.float32) * 0.01,
        'wv': jax.random.normal(keys[4], (H, H), jnp.float32) * scale,
        'bv': jax.random.normal(keys[5], (1, H), jnp.float32) * 0.01,
        'wm': jax.random.normal(keys[6], (H, H), jnp.float32) * scale,
        'bm': jax.random.normal(keys[7], (1, H), jnp.float32) * 0.01,
    }

    q = jax.random.normal(keys[8], (B, S, H), jnp.float32)
    k = jax.random.normal(keys[9], (B, S, H), jnp.float32)
    v = jax.random.normal(keys[10], (B, S, H), jnp.float32)
    # mask: last 2 key positions of batch 1 are masked; batch 0 unmasked.
    mask = jnp.zeros((B, 1, S), jnp.float32)
    mask = mask.at[1, 0, -2:].set(1.0)

    ref = _reference(v, k, q, mask, params, NH)

    # Reference-fidelity path: all-f32 MXU inputs, exact reciprocal, f32 exp.
    out_f32 = jax.block_until_ready(
        mhatt_forward(v, k, q, mask, params, num_heads=NH,
                      compute_dtype=jnp.float32))
    assert out_f32.shape == (B, S, H)
    assert jnp.allclose(out_f32, ref, atol=1e-4, rtol=1e-4), \
        "f32 path mismatch vs reference"

    # Fast path (default): bf16 MXU inputs, f32 accumulation/stats, approx recip.
    out_bf16 = jax.block_until_ready(
        mhatt_forward(v, k, q, mask, params, num_heads=NH))
    assert out_bf16.shape == (B, S, H)
    assert jnp.allclose(out_bf16, ref, atol=5e-2, rtol=5e-2), \
        "bf16 path mismatch vs reference"

    print("KERNEL_OK")
</pallas_src>

<mosaic_0001>
module attributes {stable_mosaic.version = 11 : i64} {
  func.func @_mhatt_kernel(%arg0: i32, %arg1: i32, %arg2: memref<1x8x32xf32, #tpu.memory_space<vmem>>, %arg3: memref<1x8x32xf32, #tpu.memory_space<vmem>>, %arg4: memref<1x8x32xf32, #tpu.memory_space<vmem>>, %arg5: memref<1x1x8xf32, #tpu.memory_space<vmem>>, %arg6: memref<32x32xf32, #tpu.memory_space<vmem>>, %arg7: memref<1x32xf32, #tpu.memory_space<vmem>>, %arg8: memref<32x32xf32, #tpu.memory_space<vmem>>, %arg9: memref<1x32xf32, #tpu.memory_space<vmem>>, %arg10: memref<32x32xf32, #tpu.memory_space<vmem>>, %arg11: memref<1x32xf32, #tpu.memory_space<vmem>>, %arg12: memref<32x32xf32, #tpu.memory_space<vmem>>, %arg13: memref<1x32xf32, #tpu.memory_space<vmem>>, %arg14: memref<1x8x32xf32, #tpu.memory_space<vmem>>, %arg15: memref<4x8x8xf32, #tpu.memory_space<vmem>>, %arg16: memref<4x8x8xf32, #tpu.memory_space<vmem>>) attributes {dimension_semantics = [#tpu.dimension_semantics<parallel>, #tpu.dimension_semantics<arbitrary>], iteration_bounds = array<i64: 2, 1>, scalar_prefetch = 0 : i64, scratch_operands = 2 : i64, tpu.core_type = #tpu.core_type<tc>, window_params = [{transform_indices = @transform_0, window_bounds = array<i64: 1, 8, 32>}, {transform_indices = @transform_1, window_bounds = array<i64: 1, 8, 32>}, {transform_indices = @transform_2, window_bounds = array<i64: 1, 8, 32>}, {transform_indices = @transform_3, window_bounds = array<i64: 1, 1, 8>}, {pipeline_mode = #tpu.pipeline_mode<synchronous>, transform_indices = @transform_4, window_bounds = array<i64: 32, 32>}, {pipeline_mode = #tpu.pipeline_mode<synchronous>, transform_indices = @transform_5, window_bounds = array<i64: 1, 32>}, {pipeline_mode = #tpu.pipeline_mode<synchronous>, transform_indices = @transform_6, window_bounds = array<i64: 32, 32>}, {pipeline_mode = #tpu.pipeline_mode<synchronous>, transform_indices = @transform_7, window_bounds = array<i64: 1, 32>}, {pipeline_mode = #tpu.pipeline_mode<synchronous>, transform_indices = @transform_8, window_bounds = array<i64: 32, 32>}, {pipeline_mode = #tpu.pipeline_mode<synchronous>, transform_indices = @transform_9, window_bounds = array<i64: 1, 32>}, {pipeline_mode = #tpu.pipeline_mode<synchronous>, transform_indices = @transform_10, window_bounds = array<i64: 32, 32>}, {pipeline_mode = #tpu.pipeline_mode<synchronous>, transform_indices = @transform_11, window_bounds = array<i64: 1, 32>}, {transform_indices = @transform_12, window_bounds = array<i64: 1, 8, 32>}]} {
    %c0_i32 = arith.constant 0 : i32
    %0 = arith.cmpi eq, %arg1, %c0_i32 : i32
    %1 = arith.extui %0 : i1 to i32
    %c0_i32_0 = arith.constant 0 : i32
    %2 = arith.cmpi ne, %1, %c0_i32_0 : i32
    scf.if %2 {
      %c0_28 = arith.constant 0 : index
      %c0_29 = arith.constant 0 : index
      %c0_30 = arith.constant 0 : index
      %45 = vector.load %arg3[%c0_28, %c0_29, %c0_30] : memref<1x8x32xf32, #tpu.memory_space<vmem>>, vector<1x8x32xf32>
      %46 = vector.shape_cast %45 : vector<1x8x32xf32> to vector<8x32xf32>
      %c0_31 = arith.constant 0 : index
      %c0_32 = arith.constant 0 : index
      %c0_33 = arith.constant 0 : index
      %47 = vector.load %arg4[%c0_31, %c0_32, %c0_33] : memref<1x8x32xf32, #tpu.memory_space<vmem>>, vector<1x8x32xf32>
      %48 = vector.shape_cast %47 : vector<1x8x32xf32> to vector<8x32xf32>
      %c0_34 = arith.constant 0 : index
      %c0_35 = arith.constant 0 : index
      %49 = vector.load %arg8[%c0_34, %c0_35] : memref<32x32xf32, #tpu.memory_space<vmem>>, vector<32x32xf32>
      %cst_36 = arith.constant dense<0.000000e+00> : vector<8x32xf32>
      %50 = tpu.matmul %46, %49, %cst_36 {dimension_numbers = #tpu.dot_dimension_numbers<[1], [0], [0], [1], [0, 0, 1, 1], [], []>} : vector<8x32xf32>, vector<32x32xf32>, vector<8x32xf32> -> vector<8x32xf32>
      %c0_37 = arith.constant 0 : index
      %c0_38 = arith.constant 0 : index
      %51 = vector.load %arg9[%c0_37, %c0_38] : memref<1x32xf32, #tpu.memory_space<vmem>>, vector<1x32xf32>
      %52 = vector.shape_cast %51 : vector<1x32xf32> to vector<32xf32>
      %53 = vector.shape_cast %52 : vector<32xf32> to vector<1x32xf32>
      %54 = vector.broadcast %53 : vector<1x32xf32> to vector<8x32xf32>
      %55 = arith.addf %50, %54 : vector<8x32xf32>
      %c0_39 = arith.constant 0 : index
      %c0_40 = arith.constant 0 : index
      %56 = vector.load %arg10[%c0_39, %c0_40] : memref<32x32xf32, #tpu.memory_space<vmem>>, vector<32x32xf32>
      %cst_41 = arith.constant dense<0.000000e+00> : vector<8x32xf32>
      %57 = tpu.matmul %48, %56, %cst_41 {dimension_numbers = #tpu.dot_dimension_numbers<[1], [0], [0], [1], [0, 0, 1, 1], [], []>} : vector<8x32xf32>, vector<32x32xf32>, vector<8x32xf32> -> vector<8x32xf32>
      %c0_42 = arith.constant 0 : index
      %c0_43 = arith.constant 0 : index
      %58 = vector.load %arg11[%c0_42, %c0_43] : memref<1x32xf32, #tpu.memory_space<vmem>>, vector<1x32xf32>
      %59 = vector.shape_cast %58 : vector<1x32xf32> to vector<32xf32>
      %60 = vector.shape_cast %59 : vector<32xf32> to vector<1x32xf32>
      %61 = vector.broadcast %60 : vector<1x32xf32> to vector<8x32xf32>
      %62 = arith.addf %57, %61 : vector<8x32xf32>
      %63 = vector.shape_cast %55 : vector<8x32xf32> to vector<8x4x8xf32>
      %64 = tpu.transpose %63, [1, 0, 2] : vector<8x4x8xf32> -> vector<4x8x8xf32>
      %c0_44 = arith.constant 0 : index
      %c0_45 = arith.constant 0 : index
      %c0_46 = arith.constant 0 : index
      %65 = vector.load %arg15[%c0_44, %c0_45, %c0_46] : memref<4x8x8xf32, #tpu.memory_space<vmem>>, vector<4x8x8xf32>
      tpu.vector_store %arg15[%c0_44, %c0_45, %c0_46], %64 {strides = array<i32>} : memref<4x8x8xf32, #tpu.memory_space<vmem>>, vector<4x8x8xf32>,
      %66 = vector.shape_cast %62 : vector<8x32xf32> to vector<8x4x8xf32>
      %67 = tpu.transpose %66, [1, 0, 2] : vector<8x4x8xf32> -> vector<4x8x8xf32>
      %c0_47 = arith.constant 0 : index
      %c0_48 = arith.constant 0 : index
      %c0_49 = arith.constant 0 : index
      %68 = vector.load %arg16[%c0_47, %c0_48, %c0_49] : memref<4x8x8xf32, #tpu.memory_space<vmem>>, vector<4x8x8xf32>
      tpu.vector_store %arg16[%c0_47, %c0_48, %c0_49], %67 {strides = array<i32>} : memref<4x8x8xf32, #tpu.memory_space<vmem>>, vector<4x8x8xf32>,
    } else {
    }
    %c0 = arith.constant 0 : index
    %c0_1 = arith.constant 0 : index
    %c0_2 = arith.constant 0 : index
    %3 = vector.load %arg2[%c0, %c0_1, %c0_2] : memref<1x8x32xf32, #tpu.memory_space<vmem>>, vector<1x8x32xf32>
    %4 = vector.shape_cast %3 : vector<1x8x32xf32> to vector<8x32xf32>
    %c0_3 = arith.constant 0 : index
    %c0_4 = arith.constant 0 : index
    %5 = vector.load %arg6[%c0_3, %c0_4] : memref<32x32xf32, #tpu.memory_space<vmem>>, vector<32x32xf32>
    %cst = arith.constant dense<0.000000e+00> : vector<8x32xf32>
    %6 = tpu.matmul %4, %5, %cst {dimension_numbers = #tpu.dot_dimension_numbers<[1], [0], [0], [1], [0, 0, 1, 1], [], []>} : vector<8x32xf32>, vector<32x32xf32>, vector<8x32xf32> -> vector<8x32xf32>
    %c0_5 = arith.constant 0 : index
    %c0_6 = arith.constant 0 : index
    %7 = vector.load %arg7[%c0_5, %c0_6] : memref<1x32xf32, #tpu.memory_space<vmem>>, vector<1x32xf32>
    %8 = vector.shape_cast %7 : vector<1x32xf32> to vector<32xf32>
    %9 = vector.shape_cast %8 : vector<32xf32> to vector<1x32xf32>
    %10 = vector.broadcast %9 : vector<1x32xf32> to vector<8x32xf32>
    %11 = arith.addf %6, %10 : vector<8x32xf32>
    %12 = vector.shape_cast %11 : vector<8x32xf32> to vector<8x4x8xf32>
    %13 = tpu.transpose %12, [1, 0, 2] : vector<8x4x8xf32> -> vector<4x8x8xf32>
    %c0_7 = arith.constant 0 : index
    %c0_8 = arith.constant 0 : index
    %c0_9 = arith.constant 0 : index
    %14 = vector.load %arg5[%c0_7, %c0_8, %c0_9] : memref<1x1x8xf32, #tpu.memory_space<vmem>>, vector<1x1x8xf32>
    %15 = vector.shape_cast %14 : vector<1x1x8xf32> to vector<1x8xf32>
    %c0_10 = arith.constant 0 : index
    %c0_11 = arith.constant 0 : index
    %c0_12 = arith.constant 0 : index
    %16 = vector.load %arg15[%c0_10, %c0_11, %c0_12] : memref<4x8x8xf32, #tpu.memory_space<vmem>>, vector<4x8x8xf32>
    %c0_13 = arith.constant 0 : index
    %c0_14 = arith.constant 0 : index
    %c0_15 = arith.constant 0 : index
    %17 = vector.load %arg16[%c0_13, %c0_14, %c0_15] : memref<4x8x8xf32, #tpu.memory_space<vmem>>, vector<4x8x8xf32>
    "tpu.trace_start"() <{level = 10 : i32, message = "hqd,hkd->hqk"}> : () -> ()
    %cst_16 = arith.constant dense<0.000000e+00> : vector<4x8x8xf32>
    %18 = tpu.matmul %13, %16, %cst_16 {dimension_numbers = #tpu.dot_dimension_numbers<[2], [2], [1], [1], [0, 0, 0, 1, 1, 1], [0], [0]>} : vector<4x8x8xf32>, vector<4x8x8xf32>, vector<4x8x8xf32> -> vector<4x8x8xf32>
    "tpu.trace_stop"() : () -> ()
    %19 = vector.shape_cast %15 : vector<1x8xf32> to vector<1x1x8xf32>
    %20 = vector.broadcast %19 : vector<1x1x8xf32> to vector<4x8x8xf32>
    %21 = arith.addf %18, %20 : vector<4x8x8xf32>
    %cst_17 = arith.constant dense<0xFF800000> : vector<4x8xf32>
    %22 = vector.multi_reduction <maximumf>, %21, %cst_17 [2] : vector<4x8x8xf32> to vector<4x8xf32>
    %23 = vector.shape_cast %22 : vector<4x8xf32> to vector<4x8x1xf32>
    %24 = vector.broadcast %23 : vector<4x8x1xf32> to vector<4x8x8xf32>
    %25 = arith.subf %21, %24 : vector<4x8x8xf32>
    %26 = math.exp %25 : vector<4x8x8xf32>
    %cst_18 = arith.constant dense<0.000000e+00> : vector<4x8xf32>
    %27 = vector.multi_reduction <add>, %26, %cst_18 [2] : vector<4x8x8xf32> to vector<4x8xf32>
    %28 = vector.shape_cast %27 : vector<4x8xf32> to vector<4x8x1xf32>
    "tpu.trace_start"() <{level = 10 : i32, message = "hqk,hkd->hqd"}> : () -> ()
    %cst_19 = arith.constant dense<0.000000e+00> : vector<4x8x8xf32>
    %29 = tpu.matmul %26, %17, %cst_19 {dimension_numbers = #tpu.dot_dimension_numbers<[2], [1], [1], [2], [0, 0, 0, 1, 1, 2], [0], [0]>} : vector<4x8x8xf32>, vector<4x8x8xf32>, vector<4x8x8xf32> -> vector<4x8x8xf32>
    "tpu.trace_stop"() : () -> ()
    %30 = tpu.reciprocal %28 : vector<4x8x1xf32> -> vector<4x8x1xf32>
    %31 = vector.broadcast %30 : vector<4x8x1xf32> to vector<4x8x8xf32>
    %32 = arith.mulf %29, %31 : vector<4x8x8xf32>
    %33 = tpu.transpose %32, [1, 0, 2] : vector<4x8x8xf32> -> vector<8x4x8xf32>
    %34 = vector.shape_cast %33 : vector<8x4x8xf32> to vector<8x32xf32>
    %c0_20 = arith.constant 0 : index
    %c0_21 = arith.constant 0 : index
    %35 = vector.load %arg12[%c0_20, %c0_21] : memref<32x32xf32, #tpu.memory_space<vmem>>, vector<32x32xf32>
    %cst_22 = arith.constant dense<0.000000e+00> : vector<8x32xf32>
    %36 = tpu.matmul %34, %35, %cst_22 {dimension_numbers = #tpu.dot_dimension_numbers<[1], [0], [0], [1], [0, 0, 1, 1], [], []>} : vector<8x32xf32>, vector<32x32xf32>, vector<8x32xf32> -> vector<8x32xf32>
    %c0_23 = arith.constant 0 : index
    %c0_24 = arith.constant 0 : index
    %37 = vector.load %arg13[%c0_23, %c0_24] : memref<1x32xf32, #tpu.memory_space<vmem>>, vector<1x32xf32>
    %38 = vector.shape_cast %37 : vector<1x32xf32> to vector<32xf32>
    %39 = vector.shape_cast %38 : vector<32xf32> to vector<1x32xf32>
    %40 = vector.broadcast %39 : vector<1x32xf32> to vector<8x32xf32>
    %41 = arith.addf %36, %40 : vector<8x32xf32>
    %c0_25 = arith.constant 0 : index
    %c0_26 = arith.constant 0 : index
    %c0_27 = arith.constant 0 : index
    %42 = vector.load %arg14[%c0_25, %c0_26, %c0_27] : memref<1x8x32xf32, #tpu.memory_space<vmem>>, vector<1x8x32xf32>
    %43 = vector.shape_cast %42 : vector<1x8x32xf32> to vector<8x32xf32>
    %44 = vector.shape_cast %41 : vector<8x32xf32> to vector<1x8x32xf32>
    tpu.vector_store %arg14[%c0_25, %c0_26, %c0_27], %44 {strides = array<i32>} : memref<1x8x32xf32, #tpu.memory_space<vmem>>, vector<1x8x32xf32>,
    return
  }
  func.func @transform_0(%arg0: i32, %arg1: i32) -> (i32, i32, i32) {
    %c0_i32 = arith.constant 0 : i32
    %c0_i32_0 = arith.constant 0 : i32
    return %arg0, %arg1, %c0_i32 : i32, i32, i32
  }
  func.func @transform_1(%arg0: i32, %arg1: i32) -> (i32, i32, i32) {
    %c0_i32 = arith.constant 0 : i32
    %c0_i32_0 = arith.constant 0 : i32
    %c0_i32_1 = arith.constant 0 : i32
    return %arg0, %c0_i32, %c0_i32_0 : i32, i32, i32
  }
  func.func @transform_2(%arg0: i32, %arg1: i32) -> (i32, i32, i32) {
    %c0_i32 = arith.constant 0 : i32
    %c0_i32_0 = arith.constant 0 : i32
    %c0_i32_1 = arith.constant 0 : i32
    return %arg0, %c0_i32, %c0_i32_0 : i32, i32, i32
  }
  func.func @transform_3(%arg0: i32, %arg1: i32) -> (i32, i32, i32) {
    %c0_i32 = arith.constant 0 : i32
    %c0_i32_0 = arith.constant 0 : i32
    %c0_i32_1 = arith.constant 0 : i32
    return %arg0, %c0_i32, %c0_i32_0 : i32, i32, i32
  }
  func.func @transform_4(%arg0: i32, %arg1: i32) -> (i32, i32) {
    %c0_i32 = arith.constant 0 : i32
    %c0_i32_0 = arith.constant 0 : i32
    %c0_i32_1 = arith.constant 0 : i32
    return %c0_i32, %c0_i32_0 : i32, i32
  }
  func.func @transform_5(%arg0: i32, %arg1: i32) -> (i32, i32) {
    %c0_i32 = arith.constant 0 : i32
    %c0_i32_0 = arith.constant 0 : i32
    %c0_i32_1 = arith.constant 0 : i32
    return %c0_i32, %c0_i32_0 : i32, i32
  }
  func.func @transform_6(%arg0: i32, %arg1: i32) -> (i32, i32) {
    %c0_i32 = arith.constant 0 : i32
    %c0_i32_0 = arith.constant 0 : i32
    %c0_i32_1 = arith.constant 0 : i32
    return %c0_i32, %c0_i32_0 : i32, i32
  }
  func.func @transform_7(%arg0: i32, %arg1: i32) -> (i32, i32) {
    %c0_i32 = arith.constant 0 : i32
    %c0_i32_0 = arith.constant 0 : i32
    %c0_i32_1 = arith.constant 0 : i32
    return %c0_i32, %c0_i32_0 : i32, i32
  }
  func.func @transform_8(%arg0: i32, %arg1: i32) -> (i32, i32) {
    %c0_i32 = arith.constant 0 : i32
    %c0_i32_0 = arith.constant 0 : i32
    %c0_i32_1 = arith.constant 0 : i32
    return %c0_i32, %c0_i32_0 : i32, i32
  }
  func.func @transform_9(%arg0: i32, %arg1: i32) -> (i32, i32) {
    %c0_i32 = arith.constant 0 : i32
    %c0_i32_0 = arith.constant 0 : i32
    %c0_i32_1 = arith.constant 0 : i32
    return %c0_i32, %c0_i32_0 : i32, i32
  }
  func.func @transform_10(%arg0: i32, %arg1: i32) -> (i32, i32) {
    %c0_i32 = arith.constant 0 : i32
    %c0_i32_0 = arith.constant 0 : i32
    %c0_i32_1 = arith.constant 0 : i32
    return %c0_i32, %c0_i32_0 : i32, i32
  }
  func.func @transform_11(%arg0: i32, %arg1: i32) -> (i32, i32) {
    %c0_i32 = arith.constant 0 : i32
    %c0_i32_0 = arith.constant 0 : i32
    %c0_i32_1 = arith.constant 0 : i32
    return %c0_i32, %c0_i32_0 : i32, i32
  }
  func.func @transform_12(%arg0: i32, %arg1: i32) -> (i32, i32, i32) {
    %c0_i32 = arith.constant 0 : i32
    %c0_i32_0 = arith.constant 0 : i32
    return %arg0, %arg1, %c0_i32 : i32, i32, i32
  }
}

module attributes {stable_mosaic.version = 11 : i64} {
  func.func @_mhatt_kernel(%arg0: i32, %arg1: i32, %arg2: memref<1x8x32xf32, #tpu.memory_space<vmem>>, %arg3: memref<1x8x32xf32, #tpu.memory_space<vmem>>, %arg4: memref<1x8x32xf32, #tpu.memory_space<vmem>>, %arg5: memref<1x1x8xf32, #tpu.memory_space<vmem>>, %arg6: memref<32x32xf32, #tpu.memory_space<vmem>>, %arg7: memref<1x32xf32, #tpu.memory_space<vmem>>, %arg8: memref<32x32xf32, #tpu.memory_space<vmem>>, %arg9: memref<1x32xf32, #tpu.memory_space<vmem>>, %arg10: memref<32x32xf32, #tpu.memory_space<vmem>>, %arg11: memref<1x32xf32, #tpu.memory_space<vmem>>, %arg12: memref<32x32xf32, #tpu.memory_space<vmem>>, %arg13: memref<1x32xf32, #tpu.memory_space<vmem>>, %arg14: memref<1x8x32xf32, #tpu.memory_space<vmem>>, %arg15: memref<4x8x8xf32, #tpu.memory_space<vmem>>, %arg16: memref<4x8x8xf32, #tpu.memory_space<vmem>>) attributes {dimension_semantics = [#tpu.dimension_semantics<parallel>, #tpu.dimension_semantics<arbitrary>], iteration_bounds = array<i64: 2, 1>, scalar_prefetch = 0 : i64, scratch_operands = 2 : i64, tpu.core_type = #tpu.core_type<tc>, window_params = [{transform_indices = @transform_0, window_bounds = array<i64: 1, 8, 32>}, {transform_indices = @transform_1, window_bounds = array<i64: 1, 8, 32>}, {transform_indices = @transform_2, window_bounds = array<i64: 1, 8, 32>}, {transform_indices = @transform_3, window_bounds = array<i64: 1, 1, 8>}, {pipeline_mode = #tpu.pipeline_mode<synchronous>, transform_indices = @transform_4, window_bounds = array<i64: 32, 32>}, {pipeline_mode = #tpu.pipeline_mode<synchronous>, transform_indices = @transform_5, window_bounds = array<i64: 1, 32>}, {pipeline_mode = #tpu.pipeline_mode<synchronous>, transform_indices = @transform_6, window_bounds = array<i64: 32, 32>}, {pipeline_mode = #tpu.pipeline_mode<synchronous>, transform_indices = @transform_7, window_bounds = array<i64: 1, 32>}, {pipeline_mode = #tpu.pipeline_mode<synchronous>, transform_indices = @transform_8, window_bounds = array<i64: 32, 32>}, {pipeline_mode = #tpu.pipeline_mode<synchronous>, transform_indices = @transform_9, window_bounds = array<i64: 1, 32>}, {pipeline_mode = #tpu.pipeline_mode<synchronous>, transform_indices = @transform_10, window_bounds = array<i64: 32, 32>}, {pipeline_mode = #tpu.pipeline_mode<synchronous>, transform_indices = @transform_11, window_bounds = array<i64: 1, 32>}, {transform_indices = @transform_12, window_bounds = array<i64: 1, 8, 32>}]} {
    %c0_i32 = arith.constant 0 : i32
    %0 = arith.cmpi eq, %arg1, %c0_i32 : i32
    %1 = arith.extui %0 : i1 to i32
    %c0_i32_0 = arith.constant 0 : i32
    %2 = arith.cmpi ne, %1, %c0_i32_0 : i32
    scf.if %2 {
      %c0_28 = arith.constant 0 : index
      %c0_29 = arith.constant 0 : index
      %c0_30 = arith.constant 0 : index
      %45 = vector.load %arg3[%c0_28, %c0_29, %c0_30] : memref<1x8x32xf32, #tpu.memory_space<vmem>>, vector<1x8x32xf32>
      %46 = vector.shape_cast %45 : vector<1x8x32xf32> to vector<8x32xf32>
      %c0_31 = arith.constant 0 : index
      %c0_32 = arith.constant 0 : index
      %c0_33 = arith.constant 0 : index
      %47 = vector.load %arg4[%c0_31, %c0_32, %c0_33] : memref<1x8x32xf32, #tpu.memory_space<vmem>>, vector<1x8x32xf32>
      %48 = vector.shape_cast %47 : vector<1x8x32xf32> to vector<8x32xf32>
      %c0_34 = arith.constant 0 : index
      %c0_35 = arith.constant 0 : index
      %49 = vector.load %arg8[%c0_34, %c0_35] : memref<32x32xf32, #tpu.memory_space<vmem>>, vector<32x32xf32>
      %cst_36 = arith.constant dense<0.000000e+00> : vector<8x32xf32>
      %50 = tpu.matmul %46, %49, %cst_36 {dimension_numbers = #tpu.dot_dimension_numbers<[1], [0], [0], [1], [0, 0, 1, 1], [], []>} : vector<8x32xf32>, vector<32x32xf32>, vector<8x32xf32> -> vector<8x32xf32>
      %c0_37 = arith.constant 0 : index
      %c0_38 = arith.constant 0 : index
      %51 = vector.load %arg9[%c0_37, %c0_38] : memref<1x32xf32, #tpu.memory_space<vmem>>, vector<1x32xf32>
      %52 = vector.shape_cast %51 : vector<1x32xf32> to vector<32xf32>
      %53 = vector.shape_cast %52 : vector<32xf32> to vector<1x32xf32>
      %54 = vector.broadcast %53 : vector<1x32xf32> to vector<8x32xf32>
      %55 = arith.addf %50, %54 : vector<8x32xf32>
      %c0_39 = arith.constant 0 : index
      %c0_40 = arith.constant 0 : index
      %56 = vector.load %arg10[%c0_39, %c0_40] : memref<32x32xf32, #tpu.memory_space<vmem>>, vector<32x32xf32>
      %cst_41 = arith.constant dense<0.000000e+00> : vector<8x32xf32>
      %57 = tpu.matmul %48, %56, %cst_41 {dimension_numbers = #tpu.dot_dimension_numbers<[1], [0], [0], [1], [0, 0, 1, 1], [], []>} : vector<8x32xf32>, vector<32x32xf32>, vector<8x32xf32> -> vector<8x32xf32>
      %c0_42 = arith.constant 0 : index
      %c0_43 = arith.constant 0 : index
      %58 = vector.load %arg11[%c0_42, %c0_43] : memref<1x32xf32, #tpu.memory_space<vmem>>, vector<1x32xf32>
      %59 = vector.shape_cast %58 : vector<1x32xf32> to vector<32xf32>
      %60 = vector.shape_cast %59 : vector<32xf32> to vector<1x32xf32>
      %61 = vector.broadcast %60 : vector<1x32xf32> to vector<8x32xf32>
      %62 = arith.addf %57, %61 : vector<8x32xf32>
      %63 = vector.shape_cast %55 : vector<8x32xf32> to vector<8x4x8xf32>
      %64 = tpu.transpose %63, [1, 0, 2] : vector<8x4x8xf32> -> vector<4x8x8xf32>
      %c0_44 = arith.constant 0 : index
      %c0_45 = arith.constant 0 : index
      %c0_46 = arith.constant 0 : index
      %65 = vector.load %arg15[%c0_44, %c0_45, %c0_46] : memref<4x8x8xf32, #tpu.memory_space<vmem>>, vector<4x8x8xf32>
      tpu.vector_store %arg15[%c0_44, %c0_45, %c0_46], %64 {strides = array<i32>} : memref<4x8x8xf32, #tpu.memory_space<vmem>>, vector<4x8x8xf32>,
      %66 = vector.shape_cast %62 : vector<8x32xf32> to vector<8x4x8xf32>
      %67 = tpu.transpose %66, [1, 0, 2] : vector<8x4x8xf32> -> vector<4x8x8xf32>
      %c0_47 = arith.constant 0 : index
      %c0_48 = arith.constant 0 : index
      %c0_49 = arith.constant 0 : index
      %68 = vector.load %arg16[%c0_47, %c0_48, %c0_49] : memref<4x8x8xf32, #tpu.memory_space<vmem>>, vector<4x8x8xf32>
      tpu.vector_store %arg16[%c0_47, %c0_48, %c0_49], %67 {strides = array<i32>} : memref<4x8x8xf32, #tpu.memory_space<vmem>>, vector<4x8x8xf32>,
    } else {
    }
    %c0 = arith.constant 0 : index
    %c0_1 = arith.constant 0 : index
    %c0_2 = arith.constant 0 : index
    %3 = vector.load %arg2[%c0, %c0_1, %c0_2] : memref<1x8x32xf32, #tpu.memory_space<vmem>>, vector<1x8x32xf32>
    %4 = vector.shape_cast %3 : vector<1x8x32xf32> to vector<8x32xf32>
    %c0_3 = arith.constant 0 : index
    %c0_4 = arith.constant 0 : index
    %5 = vector.load %arg6[%c0_3, %c0_4] : memref<32x32xf32, #tpu.memory_space<vmem>>, vector<32x32xf32>
    %cst = arith.constant dense<0.000000e+00> : vector<8x32xf32>
    %6 = tpu.matmul %4, %5, %cst {dimension_numbers = #tpu.dot_dimension_numbers<[1], [0], [0], [1], [0, 0, 1, 1], [], []>} : vector<8x32xf32>, vector<32x32xf32>, vector<8x32xf32> -> vector<8x32xf32>
    %c0_5 = arith.constant 0 : index
    %c0_6 = arith.constant 0 : index
    %7 = vector.load %arg7[%c0_5, %c0_6] : memref<1x32xf32, #tpu.memory_space<vmem>>, vector<1x32xf32>
    %8 = vector.shape_cast %7 : vector<1x32xf32> to vector<32xf32>
    %9 = vector.shape_cast %8 : vector<32xf32> to vector<1x32xf32>
    %10 = vector.broadcast %9 : vector<1x32xf32> to vector<8x32xf32>
    %11 = arith.addf %6, %10 : vector<8x32xf32>
    %12 = vector.shape_cast %11 : vector<8x32xf32> to vector<8x4x8xf32>
    %13 = tpu.transpose %12, [1, 0, 2] : vector<8x4x8xf32> -> vector<4x8x8xf32>
    %c0_7 = arith.constant 0 : index
    %c0_8 = arith.constant 0 : index
    %c0_9 = arith.constant 0 : index
    %14 = vector.load %arg5[%c0_7, %c0_8, %c0_9] : memref<1x1x8xf32, #tpu.memory_space<vmem>>, vector<1x1x8xf32>
    %15 = vector.shape_cast %14 : vector<1x1x8xf32> to vector<1x8xf32>
    %c0_10 = arith.constant 0 : index
    %c0_11 = arith.constant 0 : index
    %c0_12 = arith.constant 0 : index
    %16 = vector.load %arg15[%c0_10, %c0_11, %c0_12] : memref<4x8x8xf32, #tpu.memory_space<vmem>>, vector<4x8x8xf32>
    %c0_13 = arith.constant 0 : index
    %c0_14 = arith.constant 0 : index
    %c0_15 = arith.constant 0 : index
    %17 = vector.load %arg16[%c0_13, %c0_14, %c0_15] : memref<4x8x8xf32, #tpu.memory_space<vmem>>, vector<4x8x8xf32>
    "tpu.trace_start"() <{level = 10 : i32, message = "hqd,hkd->hqk"}> : () -> ()
    %cst_16 = arith.constant dense<0.000000e+00> : vector<4x8x8xf32>
    %18 = tpu.matmul %13, %16, %cst_16 {dimension_numbers = #tpu.dot_dimension_numbers<[2], [2], [1], [1], [0, 0, 0, 1, 1, 1], [0], [0]>} : vector<4x8x8xf32>, vector<4x8x8xf32>, vector<4x8x8xf32> -> vector<4x8x8xf32>
    "tpu.trace_stop"() : () -> ()
    %19 = vector.shape_cast %15 : vector<1x8xf32> to vector<1x1x8xf32>
    %20 = vector.broadcast %19 : vector<1x1x8xf32> to vector<4x8x8xf32>
    %21 = arith.addf %18, %20 : vector<4x8x8xf32>
    %cst_17 = arith.constant dense<0xFF800000> : vector<4x8xf32>
    %22 = vector.multi_reduction <maximumf>, %21, %cst_17 [2] : vector<4x8x8xf32> to vector<4x8xf32>
    %23 = vector.shape_cast %22 : vector<4x8xf32> to vector<4x8x1xf32>
    %24 = vector.broadcast %23 : vector<4x8x1xf32> to vector<4x8x8xf32>
    %25 = arith.subf %21, %24 : vector<4x8x8xf32>
    %26 = math.exp %25 : vector<4x8x8xf32>
    %cst_18 = arith.constant dense<0.000000e+00> : vector<4x8xf32>
    %27 = vector.multi_reduction <add>, %26, %cst_18 [2] : vector<4x8x8xf32> to vector<4x8xf32>
    %28 = vector.shape_cast %27 : vector<4x8xf32> to vector<4x8x1xf32>
    "tpu.trace_start"() <{level = 10 : i32, message = "hqk,hkd->hqd"}> : () -> ()
    %cst_19 = arith.constant dense<0.000000e+00> : vector<4x8x8xf32>
    %29 = tpu.matmul %26, %17, %cst_19 {dimension_numbers = #tpu.dot_dimension_numbers<[2], [1], [1], [2], [0, 0, 0, 1, 1, 2], [0], [0]>} : vector<4x8x8xf32>, vector<4x8x8xf32>, vector<4x8x8xf32> -> vector<4x8x8xf32>
    "tpu.trace_stop"() : () -> ()
    %30 = tpu.reciprocal %28 : vector<4x8x1xf32> -> vector<4x8x1xf32>
    %31 = vector.broadcast %30 : vector<4x8x1xf32> to vector<4x8x8xf32>
    %32 = arith.mulf %29, %31 : vector<4x8x8xf32>
    %33 = tpu.transpose %32, [1, 0, 2] : vector<4x8x8xf32> -> vector<8x4x8xf32>
    %34 = vector.shape_cast %33 : vector<8x4x8xf32> to vector<8x32xf32>
    %c0_20 = arith.constant 0 : index
    %c0_21 = arith.constant 0 : index
    %35 = vector.load %arg12[%c0_20, %c0_21] : memref<32x32xf32, #tpu.memory_space<vmem>>, vector<32x32xf32>
    %cst_22 = arith.constant dense<0.000000e+00> : vector<8x32xf32>
    %36 = tpu.matmul %34, %35, %cst_22 {dimension_numbers = #tpu.dot_dimension_numbers<[1], [0], [0], [1], [0, 0, 1, 1], [], []>} : vector<8x32xf32>, vector<32x32xf32>, vector<8x32xf32> -> vector<8x32xf32>
    %c0_23 = arith.constant 0 : index
    %c0_24 = arith.constant 0 : index
    %37 = vector.load %arg13[%c0_23, %c0_24] : memref<1x32xf32, #tpu.memory_space<vmem>>, vector<1x32xf32>
    %38 = vector.shape_cast %37 : vector<1x32xf32> to vector<32xf32>
    %39 = vector.shape_cast %38 : vector<32xf32> to vector<1x32xf32>
    %40 = vector.broadcast %39 : vector<1x32xf32> to vector<8x32xf32>
    %41 = arith.addf %36, %40 : vector<8x32xf32>
    %c0_25 = arith.constant 0 : index
    %c0_26 = arith.constant 0 : index
    %c0_27 = arith.constant 0 : index
    %42 = vector.load %arg14[%c0_25, %c0_26, %c0_27] : memref<1x8x32xf32, #tpu.memory_space<vmem>>, vector<1x8x32xf32>
    %43 = vector.shape_cast %42 : vector<1x8x32xf32> to vector<8x32xf32>
    %44 = vector.shape_cast %41 : vector<8x32xf32> to vector<1x8x32xf32>
    tpu.vector_store %arg14[%c0_25, %c0_26, %c0_27], %44 {strides = array<i32>} : memref<1x8x32xf32, #tpu.memory_space<vmem>>, vector<1x8x32xf32>,
    return
  }
  func.func @transform_0(%arg0: i32, %arg1: i32) -> (i32, i32, i32) {
    %c0_i32 = arith.constant 0 : i32
    %c0_i32_0 = arith.constant 0 : i32
    return %arg0, %arg1, %c0_i32 : i32, i32, i32
  }
  func.func @transform_1(%arg0: i32, %arg1: i32) -> (i32, i32, i32) {
    %c0_i32 = arith.constant 0 : i32
    %c0_i32_0 = arith.constant 0 : i32
    %c0_i32_1 = arith.constant 0 : i32
    return %arg0, %c0_i32, %c0_i32_0 : i32, i32, i32
  }
  func.func @transform_2(%arg0: i32, %arg1: i32) -> (i32, i32, i32) {
    %c0_i32 = arith.constant 0 : i32
    %c0_i32_0 = arith.constant 0 : i32
    %c0_i32_1 = arith.constant 0 : i32
    return %arg0, %c0_i32, %c0_i32_0 : i32, i32, i32
  }
  func.func @transform_3(%arg0: i32, %arg1: i32) -> (i32, i32, i32) {
    %c0_i32 = arith.constant 0 : i32
    %c0_i32_0 = arith.constant 0 : i32
    %c0_i32_1 = arith.constant 0 : i32
    return %arg0, %c0_i32, %c0_i32_0 : i32, i32, i32
  }
  func.func @transform_4(%arg0: i32, %arg1: i32) -> (i32, i32) {
    %c0_i32 = arith.constant 0 : i32
    %c0_i32_0 = arith.constant 0 : i32
    %c0_i32_1 = arith.constant 0 : i32
    return %c0_i32, %c0_i32_0 : i32, i32
  }
  func.func @transform_5(%arg0: i32, %arg1: i32) -> (i32, i32) {
    %c0_i32 = arith.constant 0 : i32
    %c0_i32_0 = arith.constant 0 : i32
    %c0_i32_1 = arith.constant 0 : i32
    return %c0_i32, %c0_i32_0 : i32, i32
  }
  func.func @transform_6(%arg0: i32, %arg1: i32) -> (i32, i32) {
    %c0_i32 = arith.constant 0 : i32
    %c0_i32_0 = arith.constant 0 : i32
    %c0_i32_1 = arith.constant 0 : i32
    return %c0_i32, %c0_i32_0 : i32, i32
  }
  func.func @transform_7(%arg0: i32, %arg1: i32) -> (i32, i32) {
    %c0_i32 = arith.constant 0 : i32
    %c0_i32_0 = arith.constant 0 : i32
    %c0_i32_1 = arith.constant 0 : i32
    return %c0_i32, %c0_i32_0 : i32, i32
  }
  func.func @transform_8(%arg0: i32, %arg1: i32) -> (i32, i32) {
    %c0_i32 = arith.constant 0 : i32
    %c0_i32_0 = arith.constant 0 : i32
    %c0_i32_1 = arith.constant 0 : i32
    return %c0_i32, %c0_i32_0 : i32, i32
  }
  func.func @transform_9(%arg0: i32, %arg1: i32) -> (i32, i32) {
    %c0_i32 = arith.constant 0 : i32
    %c0_i32_0 = arith.constant 0 : i32
    %c0_i32_1 = arith.constant 0 : i32
    return %c0_i32, %c0_i32_0 : i32, i32
  }
  func.func @transform_10(%arg0: i32, %arg1: i32) -> (i32, i32) {
    %c0_i32 = arith.constant 0 : i32
    %c0_i32_0 = arith.constant 0 : i32
    %c0_i32_1 = arith.constant 0 : i32
    return %c0_i32, %c0_i32_0 : i32, i32
  }
  func.func @transform_11(%arg0: i32, %arg1: i32) -> (i32, i32) {
    %c0_i32 = arith.constant 0 : i32
    %c0_i32_0 = arith.constant 0 : i32
    %c0_i32_1 = arith.constant 0 : i32
    return %c0_i32, %c0_i32_0 : i32, i32
  }
  func.func @transform_12(%arg0: i32, %arg1: i32) -> (i32, i32, i32) {
    %c0_i32 = arith.constant 0 : i32
    %c0_i32_0 = arith.constant 0 : i32
    return %arg0, %arg1, %c0_i32 : i32, i32, i32
  }
}

</mosaic_0001>

<bundles_post_ra>
// kernel: tpu_custom_call.1
= control target key start
LH: loop header
LB: loop body
LE: loop exit
PB: predicated region body
PF: predicated region fallthrough
CT: control target
= control target key end

     0   :  { %s3502_s0 = inlined_call_operand.hbm [shape: f32[2,8,32], index: 0, kind: input, shape index: {}]   ;;  %s3503_s1 = inlined_call_operand.hbm [shape: f32[2,8,32], index: 1, kind: input, shape index: {}]   ;;  %s3504_s2 = inlined_call_operand.hbm [shape: f32[2,8,32], index: 2, kind: input, shape index: {}]   ;;  %s3505_s3 = inlined_call_operand.vmem [shape: f32[2,1,8], index: 3, kind: input, shape index: {}]   ;;  %s3506_s4 = inlined_call_operand.hbm [shape: f32[32,32], index: 4, kind: input, shape index: {}]   ;;  %s3507_s5 = inlined_call_operand.vmem [shape: f32[1,32], index: 5, kind: input, shape index: {}]   ;;  %s3508_s6 = inlined_call_operand.hbm [shape: f32[32,32], index: 6, kind: input, shape index: {}]   ;;  %s3509_s7 = inlined_call_operand.vmem [shape: f32[1,32], index: 7, kind: input, shape index: {}]   ;;  %s3510_s8 = inlined_call_operand.hbm [shape: f32[32,32], index: 8, kind: input, shape index: {}]   ;;  %s3511_s9 = inlined_call_operand.vmem [shape: f32[1,32], index: 9, kind: input, shape index: {}]   ;;  %s3512_s10 = inlined_call_operand.hbm [shape: f32[32,32], index: 10, kind: input, shape index: {}]   ;;  %s3513_s11 = inlined_call_operand.vmem [shape: f32[1,32], index: 11, kind: input, shape index: {}]   ;;  %s3514_s12 = inlined_call_operand.hbm [shape: f32[2,8,32], index: 12, kind: output, shape index: {}]  }
   0x1   :  { %3533 = sst [smem:[#allocation29_spill]] %s3503_s1 }
   0x2   :  { %3534 = sst [smem:[#allocation30_spill]] %s3505_s3 }
   0x3   :  { %3535 = sst [smem:[#allocation31_spill]] %s3506_s4 }
   0x4   :  { %3536 = sst [smem:[#allocation32_spill]] %s3508_s6 }
   0x5   :  { %3537 = sst [smem:[#allocation33_spill]] %s3510_s8 }
   0x6   :  { %3538 = sst [smem:[#allocation34_spill]] %s3513_s11 }
   0x7   :  { %3539 = sst [smem:[#allocation35_spill]] %s3514_s12 }
   0x8   :  { %17 = vsyncpa [#allocation5], 0 }
   0x9   :  { %19 = vsyncpa [#allocation5 + $0x1], 0 }
   0xa   :  { %20 = vsyncpa [#allocation8], 0 }
   0xb   :  { %22 = vsyncpa [#allocation8 + $0x1], 0 }
   0xc   :  { %23 = vsyncpa [#allocation11], 0 }
   0xd   :  { %24 = vsyncpa [#allocation14], 0 }
   0xe   :  { %25 = vsyncpa [#allocation6], 0 }
   0xf   :  { %27 = vsyncpa [#allocation6 + $0x1], 0  ;;  %s3060_s21 = smov 0   ;;  %s3062_s22 = smov 0  }
  0x10   :  { %s3064_s23 = smov 0   ;;  %s3066_s24 = smov 0  }
  0x11   :  { %s3068_s25 = smov 0   ;;  %s3070_s26 = smov 0  }
  0x12 LB: > { %3540 = sst [smem:[#allocation22_spill]] %s2953_s21  ;;  %s3091_s27 = sadd.s32 4294967295, %s2973_s26   ;;  %s2973_s26 = sphi %s3070_s26, %s33_s26   ;;  %s2969_s25 = sphi %s3068_s25, %s3581_s25   ;;  %s2965_s24 = sphi %s3066_s24, %s3580_s24   ;;  %s2961_s23 = sphi %s3064_s23, %s3584_s23   ;;  %s2957_s22 = sphi %s3062_s22, %s3583_s22   ;;  %s2953_s21 = sphi %s3060_s21, %s3582_s21  }
  0x13   : > { %3541 = sst [smem:[#allocation23_spill]] %s2969_s25  ;;  %p2378_p0 = scmp.ge.s32.totalorder %s2973_s26, 1 }
  0x14   : > { %3542 = sst [smem:[#allocation24_spill]] %s2973_s26  ;;  %p3527_p1 = scmp.eq.s32.totalorder %s3091_s27, 0 }
  0x15   : > { %p352_p2 = scmp.lt.s32.totalorder %s2973_s26, 3  ;;  %s2975_s29 = smov [#allocation10]  }
  0x16   : > { %s364_s30 = sshll.u32 %s2975_s29, 4  ;;  %s2976_s14 = smov [#allocation13]   ;;  %s365_s30 = int_to_ptr.vmem [resolvable:$true] %s364_s30 }
  0x17   : > { %p3096_p3 = pnand %p2378_p0, %p352_p2  ;;  %s396_s15 = sshll.u32 %s2976_s14, 4  ;;  %s397_s15 = int_to_ptr.vmem [resolvable:$true] %s396_s15 }
  0x18   : > { %s2704_s16 = scalar_lea.vmem %s365_s30, 512  ;;  %p2712_p11 = scmp.lt.s32.totalorder %s365_s30, %s365_s30 }
  0x19   : > { %p2576_p4 = pneg %p3096_p3  ;;  %p2705_p8 = scmp.ne.s32.totalorder %s365_s30, %s2704_s16 }
  0x1a   : > { %p2713_p12 = scmp.lt.s32.totalorder %s2704_s16, %s2704_s16 }
  0x1b   : > { %p3105_p6 = pnand %p2576_p4, %p3527_p1 }
  0x1c   : > { %p2714_p13 = por %p2713_p12, %p2712_p11 }
  0x1d   : > { %p3528_p7 = pneg %p3105_p6 }
  0x1f   : > { %p2707_p9 = pnand %p2705_p8, %p3528_p7 }
  0x21   : > { %p2708_p10 = pneg %p2707_p9 }
  0x23   : > { %p2715_p0 = pnand %p2714_p13, %p2708_p10 }
  0x25   : > { %2718 = shalt.err (!%p2715_p0)
}
  0x26   : > { %s3515_s17 = smov 128   ;;  %s3517_s18 = smov 8  }
  0x27   : > { %s3545_s4 = sld [smem:[#allocation31_spill]]  ;;  %s2730_s29 = scalar_lea.vmem %s397_s15, 512 }
  0x28   : > { %p2731_p2 = scmp.ne.s32.totalorder %s397_s15, %s2730_s29  ;;  %p2738_p9 = scmp.lt.s32.totalorder %s397_s15, %s397_s15 }
  0x29   : > { %p2739_p10 = scmp.lt.s32.totalorder %s2730_s29, %s2730_s29 }
  0x2a   : > { %p2733_p4 = pnand %p2731_p2, %p3528_p7 }
  0x2b   : > { %p2740_p11 = por %p2739_p10, %p2738_p9 }
  0x2c   : > { %p2734_p8 = pneg %p2733_p4 }
  0x2d   : > { %2579 = dma.hbm_to_vmem [thread:$0]  (!%p3105_p6), %s3545_s4, 512, %s365_s30, [#allocation11], %s3515_s17, %s3515_s17, %s3517_s18  }
  0x2e   : > { %p2741_p12 = pnand %p2740_p11, %p2734_p8 }
  0x30   : > { %2744 = shalt.err (!%p2741_p12)
}
  0x31   : > { %s3546_s8 = sld [smem:[#allocation33_spill]]  ;;  %s2377_s30 = sadd.s32 4294967294, %s2973_s26  }
  0x32   : > { %s45_s19 = sadd.s32 1, %s2969_s25  ;;  %s54_s20 = sadd.s32 1, %s2961_s23 }
  0x33   : > { %p47_p13 = scmp.ge.s32.totalorder %s45_s19, 2  ;;  %p61_p0 = scmp.ne.s32.totalorder %s2961_s23, %s2957_s22 }
  0x34   : > { %p62_p2 = scmp.eq.s32.totalorder %s2973_s26, 0  ;;  %p67_p8 = scmp.ne.s32.totalorder %s2957_s22, %s2953_s21 }
  0x35   : > { %s3586_s19 = smov (%p47_p13, %s45_s19), 0  ;;  %p339_p9 = scmp.eq.s32.totalorder %s3091_s27, 1 }
  0x36   : > { %3547 = sst [smem:[#allocation25_spill]] %s3586_s19  ;;  %p3141_p4 = por %p62_p2, %p61_p0 }
  0x37   : > { %2585 = dma.hbm_to_vmem [thread:$0]  (!%p3105_p6), %s3546_s8, 512, %s397_s15, [#allocation14], %s3515_s17, %s3515_s17, %s3517_s18  }
  0x38   : > { %s49_s15 = ssub.s32 %s2969_s25, %s3586_s19  ;;  %p3152_p11 = por %p3527_p1, %p67_p8 }
  0x39   : > { %p52_p10 = scmp.eq.s32.totalorder %s49_s15, 0  ;;  %p3156_p12 = por %p339_p9, %p61_p0 }
  0x3a   : > { %p345_p13 = scmp.eq.s32.totalorder %s2377_s30, 1  ;;  %p2607_p5 = scmp.lt.s32.totalorder %s2973_s26, 2 }
  0x3b   : > { %s3550_s16 = scalar_select %p3156_p12, 1, 0 }
  0x3c   : > { %s3161_s17 = scalar_select %p52_p10, %s2961_s23, %s54_s20  }
  0x3d   : > { %3551 = sst [smem:[#allocation26_spill]] %s3550_s16  ;;  %p3163_p2 = por %p345_p13, %p67_p8 }
  0x3e   : > { %3552 = sst [smem:[#allocation27_spill]] %s3161_s17  ;;  %s3524_s4 = sand.u32 1, %s2961_s23  }
  0x3f   : > { %s3553_s18 = scalar_select %p3163_p2, 1, 0 }
  0x40   : > { %s3170_s8 = sshll.u32 %s2969_s25, 7  ;;  %s3174_s15 = sshll.u32 %s3524_s4, 3 }
  0x41   : > { %3554 = sst [smem:[#allocation28_spill]] %s3553_s18  ;;  %p3178_p0 = pnand %p2607_p5, %p3141_p4 }
  0x42   : > { %s448_s30 = sand.u32 1, %s2973_s26   ;;  %s3556_s1 = sld [smem:[#allocation29_spill]] }
  0x43   : > { %s452_s21 = scalar_lea.vmem [#allocation7], %s3174_s15  ;;  %s3188_s12 = scalar_lea.sflag [#allocation8], %s448_s30 }
  0x44   : > { %s459_s25 = sshll.u32 %s452_s21, 4  ;;  %p3529_p8 = pneg %p3178_p0  ;;  %s460_s25 = int_to_ptr.vmem [resolvable:$true] %s459_s25 }
  0x45   : > { %s2758_s29 = scalar_lea.vmem %s460_s25, 128  ;;  %s2979_s4 = smov [#allocation7]  }
  0x46   : > { %p2759_p9 = scmp.ne.s32.totalorder %s460_s25, %s2758_s29  ;;  %s2763_s11 = sshll.u32 %s2979_s4, 4  ;;  %s2764_s11 = int_to_ptr.vmem [resolvable:$false] %s2763_s11 }
  0x47   : > { %s2765_s26 = scalar_lea.vmem %s2764_s11, 256  ;;  %p2766_p10 = scmp.lt.s32.totalorder %s460_s25, %s2764_s11 }
  0x48   : > { %s457_s18 = scalar_lea.hbm %s3556_s1, %s3170_s8  ;;  %p2761_p5 = pnand %p2759_p9, %p3529_p8 }
  0x49   : > { %p2767_p13 = scmp.lt.s32.totalorder %s2765_s26, %s2758_s29 }
  0x4a   : > { %p2762_p4 = pneg %p2761_p5 }
  0x4b   : > { %p2768_p1 = por %p2767_p13, %p2766_p10 }
  0x4d   : > { %p2769_p7 = pnand %p2768_p1, %p2762_p4 }
  0x4f   : > { %2772 = shalt.err (!%p2769_p7)
}
  0x50   : > { %2595 = dma.hbm_to_vmem [thread:$0]  (!%p3178_p0), %s457_s18, 128, %s460_s25, %s3188_s12  }
  0x51   : > { %s2980_s21 = smov [#allocation12]   ;;  %s2981_s30 = smov [#allocation15]  }
  0x52   : > { %s380_s17 = sshll.u32 %s2980_s21, 4  ;;  %s412_s20 = sshll.u32 %s2981_s30, 4  ;;  %s381_s17 = int_to_ptr.vmem [resolvable:$true] %s380_s17  ;;  %s413_s20 = int_to_ptr.vmem [resolvable:$true] %s412_s20 }
  0x53   : > { %s2784_s1 = scalar_lea.vmem %s381_s17, 512  ;;  %p3557_p5 = pneg %p3105_p6 }
  0x54   : > { %p2785_p9 = scmp.ne.s32.totalorder %s381_s17, %s2784_s1  ;;  %p2792_p12 = scmp.lt.s32.totalorder %s381_s17, %s381_s17 }
  0x55   : > { %p2793_p10 = scmp.lt.s32.totalorder %s2784_s1, %s2784_s1 }
  0x56   : > { %p2787_p8 = pnand %p2785_p9, %p3557_p5 }
  0x57   : > { %p2794_p1 = por %p2793_p10, %p2792_p12 }
  0x58   : > { %p2788_p2 = pneg %p2787_p8 }
  0x5a   : > { %p2795_p7 = pnand %p2794_p1, %p2788_p2 }
  0x5c   : > { %2798 = shalt.err (!%p2795_p7)
}
  0x5d   : > { %s3558_s4 = smov 8   ;;  %s3559_s11 = smov 128  }
  0x5e   : > { %s3560_s6 = sld [smem:[#allocation32_spill]]  ;;  %s2810_s18 = scalar_lea.vmem %s413_s20, 512 }
  0x5f   : > { %p2811_p4 = scmp.ne.s32.totalorder %s413_s20, %s2810_s18  ;;  %p3561_p8 = pmov %p3557_p5 }
  0x60   : > { %p2818_p12 = scmp.lt.s32.totalorder %s413_s20, %s413_s20  ;;  %p2819_p2 = scmp.lt.s32.totalorder %s2810_s18, %s2810_s18 }
  0x61   : > { %p2813_p13 = pnand %p2811_p4, %p3561_p8 }
  0x62   : > { %p2820_p5 = por %p2819_p2, %p2818_p12 }
  0x63   : > { %p2814_p9 = pneg %p2813_p13 }
  0x64   : > { %2582 = dma.hbm_to_vmem [thread:$0]  (!%p3105_p6), %s3560_s6, 512, %s381_s17, [#allocation11], %s3559_s11, %s3559_s11, %s3558_s4  }
  0x65   : > { %p2821_p10 = pnand %p2820_p5, %p2814_p9 }
  0x67   : > { %2824 = shalt.err (!%p2821_p10)
}
  0x68   : > { %2588 = dma.hbm_to_vmem [thread:$0]  (!%p3105_p6), %s3512_s10, 512, %s413_s20, [#allocation14], %s3559_s11, %s3559_s11, %s3558_s4  }
  0x69   : > { %s439_s30 = scalar_lea.hbm %s3502_s0, %s3170_s8  ;;  %s433_s25 = scalar_lea.vmem [#allocation4], %s3174_s15 }
  0x6a   : > { %s441_s26 = sshll.u32 %s433_s25, 4  ;;  %s475_s6 = scalar_lea.hbm %s3504_s2, %s3170_s8  ;;  %s442_s26 = int_to_ptr.vmem [resolvable:$true] %s441_s26 }
  0x6b   : > { %s3562_s16 = sand.u32 1, %s2961_s23   ;;  %s2838_s1 = scalar_lea.vmem %s442_s26, 128 }
  0x6c   : > { %s430_s3 = scalar_lea.sflag [#allocation5], %s3562_s16  ;;  %p2839_p1 = scmp.ne.s32.totalorder %s442_s26, %s2838_s1 }
  0x6d   : > { %p3563_p7 = pneg %p3178_p0  ;;  %s2982_s20 = smov [#allocation4]  }
  0x6e   : > { %s2843_s4 = sshll.u32 %s2982_s20, 4  ;;  %s2844_s4 = int_to_ptr.vmem [resolvable:$false] %s2843_s4 }
  0x6f   : > { %p2841_p4 = pnand %p2839_p1, %p3563_p7  ;;  %s2845_s11 = scalar_lea.vmem %s2844_s4, 256 }
  0x70   : > { %p2846_p6 = scmp.lt.s32.totalorder %s442_s26, %s2844_s4  ;;  %p2847_p13 = scmp.lt.s32.totalorder %s2845_s11, %s2838_s1 }
  0x71   : > { %p2842_p8 = pneg %p2841_p4 }
  0x72   : > { %p2848_p9 = por %p2847_p13, %p2846_p6 }
  0x74   : > { %p2849_p12 = pnand %p2848_p9, %p2842_p8 }
  0x76   : > { %2852 = shalt.err (!%p2849_p12)
}
  0x77   : > { %2592 = dma.hbm_to_vmem [thread:$0]  (!%p3178_p0), %s439_s30, 128, %s442_s26, %s430_s3  }
  0x78   : > { %s470_s16 = scalar_lea.vmem [#allocation9], %s3174_s15  ;;  %p3564_p5 = pmov %p3563_p7 }
  0x79   : > { %s477_s29 = sshll.u32 %s470_s16, 4  ;;  %s2983_s17 = smov [#allocation9]   ;;  %s478_s29 = int_to_ptr.vmem [resolvable:$true] %s477_s29 }
  0x7a   : > { %s2866_s21 = scalar_lea.vmem %s478_s29, 128  ;;  %s2871_s25 = sshll.u32 %s2983_s17, 4  ;;  %s2872_s25 = int_to_ptr.vmem [resolvable:$false] %s2871_s25 }
  0x7b   : > { %p2867_p2 = scmp.ne.s32.totalorder %s478_s29, %s2866_s21  ;;  %s2873_s13 = scalar_lea.vmem %s2872_s25, 256 }
  0x7c   : > { %p2874_p7 = scmp.lt.s32.totalorder %s478_s29, %s2872_s25  ;;  %p2875_p4 = scmp.lt.s32.totalorder %s2873_s13, %s2866_s21 }
  0x7d   : > { %p2869_p10 = pnand %p2867_p2, %p3564_p5 }
  0x7e   : > { %p2876_p8 = por %p2875_p4, %p2874_p7 }
  0x7f   : > { %p2870_p1 = pneg %p2869_p10 }
  0x81   : > { %p2877_p6 = pnand %p2876_p8, %p2870_p1 }
  0x83   : > { %2880 = shalt.err (!%p2877_p6)
}
  0x84   : > { %2598 = dma.hbm_to_vmem [thread:$0]  (!%p3178_p0), %s475_s6, 128, %s478_s29, %s3188_s12  }
  0x85   : > { %492 = sbr.rel (%p3096_p3) target bundleno = 1407 (0x57f), region = 68  ;;  %s3251_s30 = sand.u32 (!%p3096_p3), 1, %s2957_s22  }
  0x86   : > { %s3254_s26 = sshll.u32 (!%p3096_p3), %s3251_s30, 3  ;;  %s495_s19 = scalar_lea.sflag (!%p3096_p3), [#allocation5], %s3251_s30 }
  0x87   : > { %s498_s18 = scalar_lea.vmem (!%p3096_p3), [#allocation4], %s3254_s26 }
  0x8a   : > { %2932 = dma.done.wait (%p3152_p11), %s495_s19, 128  }
  0x8b   : > { %2934 = vsyncadd (%p3152_p11), %s495_s19, 4294967168  ;;  %s503_s6 = sand.u32 1, %s3091_s27   ;;  %s507_s12 = scalar_lea.vmem [#allocation7], %s3254_s26 }
  0x8c   : > { %s504_s8 = scalar_lea.sflag [#allocation8], %s503_s6 }
  0x8d   : > { %2936 = dma.done.wait (%p3152_p11), %s504_s8, 256  }
  0x8e   : > { %2938 = vsyncadd (%p3152_p11), %s504_s8, 4294967040  ;;  %s516_s28 = scalar_lea.vmem [#allocation9], %s3254_s26  ;;  %p3565_p3 = scmp.eq.s32.totalorder %s3091_s27, 0 }
  0x90   : > { %2940 = dma.done.wait (%p3565_p3), [#allocation11], 1024   ;;  %p3566_p0 = pmov %p3565_p3 }
  0x92   : > { %2942 = vsyncadd (%p3566_p0), [#allocation11], 4294966272  ;;  %p3567_p13 = pmov %p3566_p0 }
  0x93   : > { %p3568_p9 = pmov %p3566_p0 }
  0x94   : > { %2944 = dma.done.wait (%p3567_p13), [#allocation14], 1024  }
  0x95   : > { %2946 = vsyncadd (%p3568_p9), [#allocation14], 4294966272  ;;  %v2984_v0 = vmov 0.0   ;;  %vm2985_vm0 = vmmov 0   ;;  %v598_v1 = vld [vmem:[#allocation12 + $0x18] sm:$0xff]  ;;  %v597_v2 = vld [vmem:[#allocation12 + $0x10] sm:$0xff]  ;;  %v779_v30 = vlaneseq }
  0x96   : > { %2468 = vmatprep.subr.mxu0 %v2984_v0  ;;  %2476 = vmatprep.mubr.msk.f32.mxu0 %vm2985_vm0, %v2984_v0  ;;  %v596_v3 = vld [vmem:[#allocation12 + $0x8] sm:$0xff]  ;;  %v683_v4 = vld [vmem:[#allocation13 + $0x18] sm:$0xff]  ;;  %v595_v5 = vld [vmem:[#allocation12] sm:$0xff]  ;;  %vm606_vm1 = vcmask 261120   ;;  %s2986_s1 = smov 104   ;;  %s2987_s20 = smov 120  }
  0x97   : > { %2479 = vmatprep.subr.mxu1 %v2984_v0  ;;  %2487 = vmatprep.mubr.msk.f32.mxu1 %vm2985_vm0, %v2984_v0  ;;  %v593_v6 = vld [vmem:[%s507_s12] sm:$0xff]  ;;  %v1069_v7 = vld [vmem:[#allocation10 + $0x18] sm:$0xff]  ;;  %v1068_v8 = vld [vmem:[#allocation10 + $0x10] sm:$0xff]  ;;  %s2988_s16 = smov 112   ;;  %v2989_v28 = vmov 1983009808  }
  0x98   : > { %2469 = vmatpush3.msra.mxu0 %v598_v1  ;;  %2480 = vmatpush3.msra.mxu1 %v683_v4  ;;  %v1067_v9 = vld [vmem:[#allocation10 + $0x8] sm:$0xff]  ;;  %v1066_v10 = vld [vmem:[#allocation10] sm:$0xff]  ;;  %v1065_v11 = vld [vmem:[%s498_s18] sm:$0xff]  ;;  %v777_v29 = vunpack.c.l.s4 %v2989_v28  ;;  %v2990_v31 = vmov 1934713408   ;;  %v780_v34 = vshrl.u32 %v779_v30, 7 }
  0x99   : > { %2470 = vmatprep.subr.mxu0 %v2984_v0  ;;  %2481 = vmatprep.subr.mxu1 %v2984_v0  ;;  %v682_v12 = vld [vmem:[#allocation13 + $0x10] sm:$0xff]  ;;  %v681_v13 = vld [vmem:[#allocation13 + $0x8] sm:$0xff]  ;;  %v680_v14 = vld [vmem:[#allocation13] sm:$0xff]  ;;  %v809_v32 = vunpack.c.l.s4 %v2990_v31  ;;  %vm910_vm2 = vcmask 64512   ;;  %p586_p11 = scmp.lt.s32.totalorder %s2965_s24, 1  ;;  %s3569_s3 = sld [smem:[#allocation30_spill]] }
  0x9a   : > { %2471 = vmatpush3.msra.mxu0 %v597_v2  ;;  %2482 = vmatpush3.msra.mxu1 %v682_v12  ;;  %v594_v15 = vld [vmem:[%s516_s28] sm:$0xff]  ;;  %v778_v33 = vunpack.c.0.s8 %v777_v29  ;;  %s2991_s19 = smov 16   ;;  %s2992_s18 = smov 8   ;;  %vm2102_vm3 = vcmask 130048   ;;  %vm2104_vm4 = vcmask 195584  }
  0x9b   : > { %2472 = vmatprep.subr.mxu0 %v2984_v0  ;;  %2483 = vmatprep.subr.mxu1 %v2984_v0  ;;  %v2399_v16 = vld [vmem:[%s3509_s7] ss:$0 sm:$0xff]  ;;  %v810_v37 = vunpack.c.0.s8 %v809_v32  ;;  %s587_s17 = scalar_select %p586_p11, %s2965_s24, 1 }
  0x9c   : > { %2473 = vmatpush3.msra.mxu0 %v596_v3  ;;  %2484 = vmatpush3.msra.mxu1 %v681_v13  ;;  %v2407_v20 = vld [vmem:[%s3507_s5] ss:$0 sm:$0xff]  ;;  %v3322_v38 = vsub.s32 %v778_v33, %v780_v34  ;;  %s2993_s6 = smov 24   ;;  %s3570_s8 = sld [smem:[#allocation26_spill]] }
  0x9d   : > { %2474 = vmatprep.subr.mxu0 %v2984_v0  ;;  %2485 = vmatprep.subr.mxu1 %v2984_v0  ;;  %v2401_v24 = vld [vmem:[%s3511_s9] ss:$0 sm:$0xff]  ;;  %v3324_v44 = vsub.s32 %v810_v37, %v780_v34  ;;  %s3571_s27 = sld [smem:[#allocation34_spill]]  ;;  %s2429_s14 = sshll.u32 %s2965_s24, 7 }
  0x9e   : > { %2475 = vmatpush3.msra.mxu0 %v595_v5  ;;  %2486 = vmatpush3.msra.mxu1 %v680_v14  ;;  %s2192_s21 = scalar_lea.sflag [#allocation6], %s3251_s30  ;;  %s2994_s24 = smov [#allocation16]  }
  0x9f   : > { %2477 = vmatmul.mubr.msk.f32.vlgmr.msra.gmra.mxu0 %vm606_vm1, %v593_v6  ;;  %2490 = vmatprep.subr.mxu0 %v2984_v0  ;;  %s588_s15 = scalar_lea.vmem %s3569_s3, %s587_s17 }
  0xa0   : > { %2491 = vmatpush3.msra.mxu0 %v1069_v7  ;;  %2498 = vmatprep.mubr.msk.f32.mxu0 %vm2985_vm0, %v2984_v0 }
  0xa1   : > { %2492 = vmatprep.subr.mxu0 %v2984_v0  ;;  %2488 = vmatmul.mubr.msk.f32.vlgmr.msra.gmra.mxu1 %vm606_vm1, %v594_v15 }
  0xa2   : > { %2493 = vmatpush3.msra.mxu0 %v1068_v8  ;;  %2501 = vmatprep.subr.mxu1 %v2984_v0  ;;  %p3573_p2 = scmp.ne.s32.totalorder %s3570_s8, 0 }
  0xa3   : > { %2494 = vmatprep.subr.mxu0 %v2984_v0  ;;  %2503 = vmatprep.mubr.msk.f32.mxu1 %vm2985_vm0, %v2984_v0 }
  0xa4   : > { %2495 = vmatpush3.msra.mxu0 %v1067_v9 }
  0xa5   : > { %2496 = vmatprep.subr.mxu0 %v2984_v0 }
  0xa6   : > { %2497 = vmatpush3.msra.mxu0 %v1066_v10 }
  0xa7   : > { %2499 = vmatmul.mubr.msk.f32.vlgmr.msra.gmra.mxu0 %vm606_vm1, %v1065_v11  ;;  %2521 = vmatprep.subr.mxu0 %v2984_v0 }
  0xa8   : > { %2523 = vmatprep.mubr.msk.f32.mxu0 %vm2985_vm0, %v2984_v0 }
 0x15f   : > { %v676_v17 = vpop.f32.mrf.mxu0 }
 0x160   : > { %v677_v18 = vadd.f32 %v2399_v16, %v676_v17 }
 0x161   : > { %v2478_v19 = vpop.f32.mrf.mxu0  ;;  %v760_v25 = vpop.f32.mrf.mxu1 }
 0x162   : > { %771 = vrot.lane.b32.xlu1 %v677_v18, %s2986_s1  ;;  %765 = vrot.lane.b32.xlu0 %v677_v18, %s2987_s20  ;;  %v3317_v26 = vadd.f32 %v2401_v24, %v760_v25 }
 0x163   : > { %v2489_v27 = vpop.f32.mrf.mxu1 }
 0x166   : > { %768 = vrot.lane.b32.xlu0 %v677_v18, %s2988_s16 }
 0x167   : > { %v1147_v21 = vpop.f32.mrf.mxu0 }
 0x168   : > { %v1148_v22 = vadd.f32 %v2407_v20, %v1147_v21 }
 0x169   : > { %v2500_v23 = vpop.f32.mrf.mxu0 }
 0x16a   : > { %1155 = vrot.lane.b32.xlu0 %v1148_v22, %s2988_s16  ;;  %1152 = vrot.lane.b32.xlu1 %v1148_v22, %s2987_s20 }
 0x16e   : > { %1158 = vrot.lane.b32.xlu1 %v1148_v22, %s2986_s1  ;;  %916 = vrot.lane.b32.xlu0 %v3317_v26, %s2987_s20 }
 0x172   : > { %919 = vrot.lane.b32.xlu1 %v3317_v26, %s2988_s16  ;;  %922 = vrot.lane.b32.xlu0 %v3317_v26, %s2986_s1  ;;  %s585_s1 = scalar_lea.vmem [#allocation16], %s3254_s26  ;;  %s3572_s16 = sld [smem:[#allocation35_spill]] }
 0x173   : > { %s2206_s20 = sshll.u32 %s585_s1, 4  ;;  %s2885_s26 = sshll.u32 %s2994_s24, 4  ;;  %s2207_s20 = int_to_ptr.vmem [resolvable:$true] %s2206_s20  ;;  %s2886_s26 = int_to_ptr.vmem [resolvable:$false] %s2885_s26 }
 0x174   : > { %s2881_s17 = scalar_lea.vmem %s2207_s20, 128  ;;  %s2887_s25 = scalar_lea.vmem %s2886_s26, 256 }
 0x175   : > { %p2882_p12 = scmp.ne.s32.totalorder %s2207_s20, %s2881_s17  ;;  %p2888_p1 = scmp.lt.s32.totalorder %s2207_s20, %s2886_s26 }
 0x176   : > { %p2889_p7 = scmp.lt.s32.totalorder %s2887_s25, %s2881_s17 }
 0x177   : > { %p2883_p5 = pnand %p2882_p12, %p3573_p2 }
 0x178   : > { %s3459_s29 = scalar_lea.hbm %s3572_s16, %s2429_s14  ;;  %p2890_p4 = por %p2889_p7, %p2888_p1 }
 0x179   : > { %p2884_p10 = pneg %p2883_p5 }
 0x17b   : > { %p2891_p8 = pnand %p2890_p4, %p2884_p10 }
 0x1d4   : > { %v772_v35 = vpop.permute.xlu1 %771  ;;  %v766_v36 = vpop.permute.xlu0 %765 }
 0x1d5   : > { %v790_v39 = vcombine.low %v766_v36, %v772_v35  ;;  %v791_v40 = vcombine.high %v766_v36, %v772_v35 }
 0x1d7   : > { %v798_v45 = vrot.slane %v790_v39, %v3322_v38  ;;  %v805_v46 = vrot.slane %v791_v40, %v3322_v38 }
 0x1d8   : > { %v769_v41 = vpop.permute.xlu0 %768 }
 0x1d9   : > { %v774_v42 = vcombine.low %v677_v18, %v769_v41  ;;  %v775_v43 = vcombine.high %v677_v18, %v769_v41 }
 0x1db   : > { %v782_v47 = vrot.slane %v774_v42, %v3322_v38  ;;  %v789_v48 = vrot.slane %v775_v43, %v3322_v38 }
 0x1dc   : > { %v1153_v49 = vpop.permute.xlu1 %1152  ;;  %v1156_v54 = vpop.permute.xlu0 %1155 }
 0x1dd   : > { %v806_v50 = vcombine.low %v782_v47, %v798_v45  ;;  %v807_v51 = vcombine.high %v782_v47, %v798_v45  ;;  %v822_v52 = vcombine.low %v789_v48, %v805_v46  ;;  %v823_v53 = vcombine.high %v789_v48, %v805_v46 }
 0x1de   : > { %v1161_v59 = vcombine.low %v1148_v22, %v1156_v54  ;;  %v1162_v60 = vcombine.high %v1148_v22, %v1156_v54 }
 0x1df   : > { %v814_v55 = vrot.slane %v806_v50, %v3324_v44  ;;  %v821_v56 = vrot.slane %v807_v51, %v3324_v44  ;;  %v830_v57 = vrot.slane %v822_v52, %v3324_v44  ;;  %v837_v58 = vrot.slane %v823_v53, %v3324_v44 }
 0x1e0   : > { %v1159_v61 = vpop.permute.xlu1 %1158  ;;  %v1169_v9 = vrot.slane %v1161_v59, %v3322_v38  ;;  %v1176_v10 = vrot.slane %v1162_v60, %v3322_v38  ;;  %v917_v60 = vpop.permute.xlu0 %916 }
 0x1e1   : > { %v842_v62 = vcombine.low %v814_v55, %v821_v56  ;;  %v2403_v63 = vcombine.high %v814_v55, %v821_v56  ;;  %v858_v1 = vcombine.low %v830_v57, %v837_v58  ;;  %v2404_v2 = vcombine.high %v830_v57, %v837_v58 }
 0x1e2   : > { %v1177_v3 = vcombine.low %v1153_v49, %v1159_v61  ;;  %v1178_v4 = vcombine.high %v1153_v49, %v1159_v61 }
 0x1e3   : > { %v849_v5 = vrot.slane %v842_v62, %v3322_v38  ;;  %v857_v6 = vrot.slane %v2403_v63, %v3322_v38  ;;  %v865_v7 = vrot.slane %v858_v1, %v3322_v38  ;;  %v873_v8 = vrot.slane %v2404_v2, %v3322_v38 }
 0x1e4   : > { %v1185_v11 = vrot.slane %v1177_v3, %v3322_v38  ;;  %v1192_v12 = vrot.slane %v1178_v4, %v3322_v38  ;;  %v920_v61 = vpop.permute.xlu1 %919  ;;  %v923_v1 = vpop.permute.xlu0 %922 }
 0x1e5   : > { %v874_v13 = vcombine.low %v849_v5, %v857_v6  ;;  %v875_v14 = vcombine.high %v849_v5, %v857_v6  ;;  %v890_v15 = vcombine.low %v865_v7, %v873_v8  ;;  %v891_v16 = vcombine.high %v865_v7, %v873_v8 }
 0x1e6   : > { %v1193_v17 = vcombine.low %v1169_v9, %v1185_v11  ;;  %v1194_v18 = vcombine.high %v1169_v9, %v1185_v11  ;;  %v1209_v19 = vcombine.low %v1176_v10, %v1192_v12  ;;  %v1210_v20 = vcombine.high %v1176_v10, %v1192_v12 }
 0x1e7   : > { %v882_v21 = vrot.slane %v874_v13, %v3324_v44  ;;  %v889_v22 = vrot.slane %v875_v14, %v3324_v44  ;;  %v898_v23 = vrot.slane %v890_v15, %v3324_v44  ;;  %v905_v24 = vrot.slane %v891_v16, %v3324_v44 }
 0x1e8   : > { %v1201_v25 = vrot.slane %v1193_v17, %v3324_v44  ;;  %v1208_v27 = vrot.slane %v1194_v18, %v3324_v44  ;;  %v1217_v28 = vrot.slane %v1209_v19, %v3324_v44  ;;  %v1224_v29 = vrot.slane %v1210_v20, %v3324_v44 }
 0x1e9   : > { %v906_v30 = vcombine.low %v882_v21, %v898_v23  ;;  %v907_v31 = vcombine.high %v882_v21, %v898_v23  ;;  %v908_v32 = vcombine.low %v889_v22, %v905_v24  ;;  %v909_v33 = vcombine.high %v889_v22, %v905_v24 }
 0x1ea   : > { %v1229_v34 = vcombine.low %v1201_v25, %v1208_v27  ;;  %v2409_v35 = vcombine.high %v1201_v25, %v1208_v27  ;;  %v1245_v36 = vcombine.low %v1217_v28, %v1224_v29  ;;  %v2410_v37 = vcombine.high %v1217_v28, %v1224_v29 }
 0x1eb   : > { %911 = vst.msk [vmem:[#allocation2] sm:$0xff] %vm910_vm2, %v906_v30  ;;  %912 = vst.msk [vmem:[#allocation2 + $0x8] sm:$0xff] %vm910_vm2, %v907_v31  ;;  %v925_v62 = vcombine.low %v3317_v26, %v920_v61  ;;  %v926_v63 = vcombine.high %v3317_v26, %v920_v61  ;;  %v941_v2 = vcombine.low %v917_v60, %v923_v1 }
 0x1ec   : > { %913 = vst.msk [vmem:[#allocation2 + $0x10] sm:$0xff] %vm910_vm2, %v908_v32  ;;  %914 = vst.msk [vmem:[#allocation2 + $0x18] sm:$0xff] %vm910_vm2, %v909_v33  ;;  %v1236_v39 = vrot.slane %v1229_v34, %v3322_v38  ;;  %v1244_v40 = vrot.slane %v2409_v35, %v3322_v38  ;;  %v1252_v41 = vrot.slane %v1245_v36, %v3322_v38 }
 0x1ed   : > { %v1260_v42 = vrot.slane %v2410_v37, %v3322_v38  ;;  %v942_v3 = vcombine.high %v917_v60, %v923_v1  ;;  %v933_v4 = vrot.slane %v925_v62, %v3322_v38  ;;  %v940_v5 = vrot.slane %v926_v63, %v3322_v38 }
 0x1ee   : > { %v1261_v43 = vcombine.low %v1236_v39, %v1244_v40  ;;  %v1262_v49 = vcombine.high %v1236_v39, %v1244_v40  ;;  %v949_v6 = vrot.slane %v941_v2, %v3322_v38  ;;  %v2411_v39 = vld [vmem:[%s588_s15] ss:$0 sm:$0xff] }
 0x1ef   : > { %v1277_v45 = vcombine.low %v1252_v41, %v1260_v42  ;;  %v1278_v50 = vcombine.high %v1252_v41, %v1260_v42  ;;  %v956_v7 = vrot.slane %v942_v3, %v3322_v38 }
 0x1f0   : > { %v1269_v46 = vrot.slane %v1261_v43, %v3324_v44  ;;  %v1276_v54 = vrot.slane %v1262_v49, %v3324_v44  ;;  %v957_v8 = vcombine.low %v933_v4, %v949_v6  ;;  %v958_v9 = vcombine.high %v933_v4, %v949_v6 }
 0x1f1   : > { %v1285_v47 = vrot.slane %v1277_v45, %v3324_v44  ;;  %v1292_v55 = vrot.slane %v1278_v50, %v3324_v44  ;;  %v973_v10 = vcombine.low %v940_v5, %v956_v7  ;;  %v974_v11 = vcombine.high %v940_v5, %v956_v7 }
 0x1f2   : > { %v1298_v48 = vld [vmem:[#allocation2] sm:$0xff]  ;;  %v1299_v52 = vld [vmem:[#allocation2 + $0x8] sm:$0xff]  ;;  %v965_v12 = vrot.slane %v957_v8, %v3324_v44  ;;  %v972_v13 = vrot.slane %v958_v9, %v3324_v44 }
 0x1f3   : > { %2502 = vmatpush3.xpose.msk.msra.mxu1 %vm910_vm2, %v1298_v48  ;;  %v1293_v51 = vcombine.low %v1269_v46, %v1285_v47  ;;  %v1294_v53 = vcombine.high %v1269_v46, %v1285_v47  ;;  %v1300_v56 = vld [vmem:[#allocation2 + $0x10] sm:$0xff]  ;;  %v1295_v57 = vcombine.low %v1276_v54, %v1292_v55  ;;  %v1301_v58 = vld [vmem:[#allocation2 + $0x18] sm:$0xff]  ;;  %v1296_v59 = vcombine.high %v1276_v54, %v1292_v55 }
 0x1f4   : > { %2506 = vmatprep.subr.mxu1 %v2984_v0  ;;  %v981_v26 = vrot.slane %v973_v10, %v3324_v44  ;;  %v988_v14 = vrot.slane %v974_v11, %v3324_v44  ;;  %v993_v15 = vcombine.low %v965_v12, %v972_v13  ;;  %v2405_v16 = vcombine.high %v965_v12, %v972_v13 }
 0x1f6   : > { %2504 = vmatmul.mubr.msk.f32.vlgmr.msra.gmra.mxu1 %vm910_vm2, %v1293_v51  ;;  %v1009_v17 = vcombine.low %v981_v26, %v988_v14  ;;  %v2406_v18 = vcombine.high %v981_v26, %v988_v14  ;;  %v1000_v19 = vrot.slane %v993_v15, %v3322_v38  ;;  %v1008_v20 = vrot.slane %v2405_v16, %v3322_v38  ;;  %v2109_v15 = vld [vmem:[#allocation15 + $0x18] sm:$0xff] }
 0x1f7   : > { %2507 = vmatpush3.xpose.msk.msra.mxu1 %vm910_vm2, %v1299_v52  ;;  %2508 = vmatprep.mubr.msk.f32.mxu1 %vm2985_vm0, %v2984_v0 }
 0x1f8   : > { %2511 = vmatprep.subr.mxu1 %v2984_v0  ;;  %v1016_v21 = vrot.slane %v1009_v17, %v3322_v38  ;;  %v1024_v22 = vrot.slane %v2406_v18, %v3322_v38  ;;  %v1025_v23 = vcombine.low %v1000_v19, %v1008_v20  ;;  %v1026_v24 = vcombine.high %v1000_v19, %v1008_v20 }
 0x1fa   : > { %2509 = vmatmul.mubr.msk.f32.vlgmr.msra.gmra.mxu1 %vm910_vm2, %v1294_v53  ;;  %v1041_v25 = vcombine.low %v1016_v21, %v1024_v22  ;;  %v1042_v27 = vcombine.high %v1016_v21, %v1024_v22  ;;  %v1033_v28 = vrot.slane %v1025_v23, %v3324_v44  ;;  %v1040_v29 = vrot.slane %v1026_v24, %v3324_v44 }
 0x1fb   : > { %2512 = vmatpush3.xpose.msk.msra.mxu1 %vm910_vm2, %v1300_v56  ;;  %2513 = vmatprep.mubr.msk.f32.mxu1 %vm2985_vm0, %v2984_v0 }
 0x1fc   : > { %2516 = vmatprep.subr.mxu1 %v2984_v0  ;;  %v1049_v30 = vrot.slane %v1041_v25, %v3324_v44  ;;  %v1056_v31 = vrot.slane %v1042_v27, %v3324_v44 }
 0x1fe   : > { %2514 = vmatmul.mubr.msk.f32.vlgmr.msra.gmra.mxu1 %vm910_vm2, %v1295_v57  ;;  %v1057_v32 = vcombine.low %v1033_v28, %v1049_v30  ;;  %v1058_v33 = vcombine.high %v1033_v28, %v1049_v30  ;;  %v1059_v34 = vcombine.low %v1040_v29, %v1056_v31  ;;  %v1060_v35 = vcombine.high %v1040_v29, %v1056_v31 }
 0x1ff   : > { %2517 = vmatpush3.xpose.msk.msra.mxu1 %vm910_vm2, %v1301_v58  ;;  %2518 = vmatprep.mubr.msk.f32.mxu1 %vm2985_vm0, %v2984_v0 }
 0x200   : > { %2526 = vmatprep.subr.mxu1 %v2984_v0  ;;  %1061 = vst.msk [vmem:[#allocation3] sm:$0xff] %vm910_vm2, %v1057_v32  ;;  %1062 = vst.msk [vmem:[#allocation3 + $0x8] sm:$0xff] %vm910_vm2, %v1058_v33 }
 0x201   : > { %1063 = vst.msk [vmem:[#allocation3 + $0x10] sm:$0xff] %vm910_vm2, %v1059_v34  ;;  %1064 = vst.msk [vmem:[#allocation3 + $0x18] sm:$0xff] %vm910_vm2, %v1060_v35 }
 0x202   : > { %2519 = vmatmul.mubr.msk.f32.vlgmr.msra.gmra.mxu1 %vm910_vm2, %v1296_v59 }
 0x203   : > { %2528 = vmatprep.mubr.msk.f32.mxu1 %vm2985_vm0, %v2984_v0 }
 0x207   : > { %v1302_v36 = vld [vmem:[#allocation3] sm:$0xff]  ;;  %v1303_v37 = vld [vmem:[#allocation3 + $0x8] sm:$0xff] }
 0x208   : > { %2522 = vmatpush3.msra.mxu0 %v1302_v36  ;;  %2527 = vmatpush3.msra.mxu1 %v1303_v37  ;;  %v1304_v7 = vld [vmem:[#allocation3 + $0x10] sm:$0xff]  ;;  %v1305_v10 = vld [vmem:[#allocation3 + $0x18] sm:$0xff] }
 0x209   : > { %2531 = vmatprep.subr.mxu0 %v2984_v0  ;;  %2536 = vmatprep.subr.mxu1 %v2984_v0 }
 0x2b6   : > { %v1385_v40 = vpop.f32.mrf.mxu1 }
 0x2b7   : > { %v1386_v41 = vadd.f32 %v2411_v39, %v1385_v40 }
 0x2b8   : > { %v2505_v42 = vpop.f32.mrf.mxu1 }
 0x2b9   : > { %v1617_v43 = vsel %vm910_vm2, %v1386_v41, -inf }
 0x2ba   : > { %1618 = vmax.xlane.f32.xlu0 %v1617_v43  ;;  %v1461_v45 = vpop.f32.mrf.mxu1 }
 0x2bb   : > { %v1462_v46 = vadd.f32 %v2411_v39, %v1461_v45 }
 0x2bc   : > { %v2510_v47 = vpop.f32.mrf.mxu1 }
 0x2bd   : > { %v1620_v48 = vsel %vm910_vm2, %v1462_v46, -inf }
 0x2be   : > { %1621 = vmax.xlane.f32.xlu1 %v1620_v48  ;;  %v1537_v49 = vpop.f32.mrf.mxu1 }
 0x2bf   : > { %v1538_v50 = vadd.f32 %v2411_v39, %v1537_v49 }
 0x2c0   : > { %v2515_v51 = vpop.f32.mrf.mxu1 }
 0x2c1   : > { %v1623_v52 = vsel %vm910_vm2, %v1538_v50, -inf  ;;  %v2108_v51 = vld [vmem:[#allocation15 + $0x10] sm:$0xff] }
 0x2c2   : > { %1624 = vmax.xlane.f32.xlu1 %v1623_v52  ;;  %v1613_v53 = vpop.f32.mrf.mxu1  ;;  %v2107_v52 = vld [vmem:[#allocation15 + $0x8] sm:$0xff] }
 0x2c3   : > { %v1614_v54 = vadd.f32 %v2411_v39, %v1613_v53 }
 0x2c4   : > { %v2520_v55 = vpop.f32.mrf.mxu1 }
 0x2c5   : > { %v1626_v56 = vsel %vm910_vm2, %v1614_v54, -inf }
 0x2c6   : > { %1627 = vmax.xlane.f32.xlu0 %v1626_v56 }
 0x343   : > { %v1619_v57 = vpop.xlane.xlu0 %1618 }
 0x344   : > { %v1629_v58 = vsub.f32 %v1386_v41, %v1619_v57 }
 0x346   : > { %v1633_v59 = vmul.f32 1.442695, %v1629_v58 }
 0x347   : > { %v1622_v60 = vpop.xlane.xlu1 %1621 }
 0x348   : > { %2677 = vpow2.f32 %v1633_v59  ;;  %v1630_v61 = vsub.f32 %v1462_v46, %v1622_v60 }
 0x34a   : > { %v1635_v62 = vmul.f32 1.442695, %v1630_v61  ;;  %v2106_v61 = vld [vmem:[#allocation15] sm:$0xff] }
 0x34b   : > { %v1625_v63 = vpop.xlane.xlu1 %1624 }
 0x34c   : > { %2679 = vpow2.f32 %v1635_v62  ;;  %v1631_v1 = vsub.f32 %v1538_v50, %v1625_v63 }
 0x34e   : > { %v1637_v2 = vmul.f32 1.442695, %v1631_v1 }
 0x34f   : > { %v1628_v3 = vpop.xlane.xlu0 %1627 }
 0x350   : > { %2681 = vpow2.f32 %v1637_v2  ;;  %v1632_v4 = vsub.f32 %v1614_v54, %v1628_v3 }
 0x352   : > { %v1639_v5 = vmul.f32 1.442695, %v1632_v4 }
 0x354   : > { %2683 = vpow2.f32 %v1639_v5 }
 0x355   : > { %v2678_v6 = vpop.eup %2677 }
 0x356   : > { %2524 = vmatmul.mubr.msk.f32.vlgmr.msra.gmra.mxu0 %vm910_vm2, %v2678_v6  ;;  %v1641_v8 = vsel %vm910_vm2, %v2678_v6, 0.0 }
 0x357   : > { %2532 = vmatpush3.msra.mxu0 %v1304_v7  ;;  %1642 = vadd.xlane.f32.xlu0 %v1641_v8 }
 0x358   : > { %2533 = vmatprep.mubr.msk.f32.mxu0 %vm2985_vm0, %v2984_v0  ;;  %2541 = vmatprep.subr.mxu0 %v2984_v0 }
 0x359   : > { %v2680_v9 = vpop.eup %2679 }
 0x35a   : > { %2529 = vmatmul.mubr.msk.f32.vlgmr.msra.gmra.mxu1 %vm910_vm2, %v2680_v9  ;;  %v1644_v11 = vsel %vm910_vm2, %v2680_v9, 0.0 }
 0x35b   : > { %2537 = vmatpush3.msra.mxu1 %v1305_v10  ;;  %1645 = vadd.xlane.f32.xlu1 %v1644_v11 }
 0x35c   : > { %2538 = vmatprep.mubr.msk.f32.mxu1 %vm2985_vm0, %v2984_v0 }
 0x35d   : > { %v2682_v12 = vpop.eup %2681 }
 0x35e   : > { %2534 = vmatmul.mubr.msk.f32.vlgmr.msra.gmra.mxu0 %vm910_vm2, %v2682_v12  ;;  %v1647_v13 = vsel %vm910_vm2, %v2682_v12, 0.0 }
 0x35f   : > { %1648 = vadd.xlane.f32.xlu0 %v1647_v13  ;;  %2549 = vmatprep.mubr.msk.f32.mxu0 %vm2985_vm0, %v2984_v0 }
 0x360   : > { %2542 = vmatpush3.msra.mxu0 %v2109_v15 }
 0x361   : > { %v2684_v26 = vpop.eup %2683  ;;  %2543 = vmatprep.subr.mxu0 %v2984_v0 }
 0x362   : > { %2539 = vmatmul.mubr.msk.f32.vlgmr.msra.gmra.mxu1 %vm910_vm2, %v2684_v26  ;;  %v1650_v14 = vsel %vm910_vm2, %v2684_v26, 0.0  ;;  %2544 = vmatpush3.msra.mxu0 %v2108_v51 }
 0x363   : > { %1651 = vadd.xlane.f32.xlu1 %v1650_v14  ;;  %2545 = vmatprep.subr.mxu0 %v2984_v0 }
 0x364   : > { %2546 = vmatpush3.msra.mxu0 %v2107_v52 }
 0x365   : > { %2547 = vmatprep.subr.mxu0 %v2984_v0 }
 0x366   : > { %2548 = vmatpush3.msra.mxu0 %v2106_v61 }
 0x3e0   : > { %v1643_v16 = vpop.xlane.xlu0 %1642 }
 0x3e4   : > { %v1646_v17 = vpop.xlane.xlu1 %1645 }
 0x3e8   : > { %v1649_v18 = vpop.xlane.xlu0 %1648 }
 0x3e9   : > { %2685 = vrcp.f32 %v1649_v18 }
 0x3ea   : > { %2687 = vrcp.f32 %v1643_v16 }
 0x3eb   : > { %2689 = vrcp.f32 %v1646_v17  ;;  %v2426_v17 = vld [vmem:[%s3571_s27] ss:$0 sm:$0xff] }
 0x3ec   : > { %v1652_v19 = vpop.xlane.xlu1 %1651 }
 0x3ed   : > { %2691 = vrcp.f32 %v1652_v19 }
 0x3f6   : > { %v2686_v24 = vpop.eup %2685 }
 0x3f7   : > { %v2688_v28 = vpop.eup %2687 }
 0x3f8   : > { %v2690_v30 = vpop.eup %2689 }
 0x3fa   : > { %v2692_v32 = vpop.eup %2691 }
 0x416   : > { %v1722_v20 = vpop.f32.mrf.mxu0 }
 0x417   : > { %v1949_v31 = vmul.f32 %v2688_v28, %v1722_v20 }
 0x418   : > { %v2525_v21 = vpop.f32.mrf.mxu0 }
 0x41a   : > { %v1795_v22 = vpop.f32.mrf.mxu1 }
 0x41b   : > { %v1950_v34 = vmul.f32 %v2690_v30, %v1795_v22 }
 0x41c   : > { %v2530_v23 = vpop.f32.mrf.mxu1 }
 0x41e   : > { %v1868_v25 = vpop.f32.mrf.mxu0 }
 0x41f   : > { %v1951_v27 = vmul.f32 %v2686_v24, %v1868_v25 }
 0x420   : > { %v2535_v29 = vpop.f32.mrf.mxu0 }
 0x421   : > { %v1953_v35 = vcombine.low %v1949_v31, %v1951_v27  ;;  %v1954_v36 = vcombine.high %v1949_v31, %v1951_v27 }
 0x422   : > { %v1941_v33 = vpop.f32.mrf.mxu1 }
 0x423   : > { %v1952_v37 = vmul.f32 %v2692_v32, %v1941_v33  ;;  %v1961_v42 = vrot.slane %v1953_v35, %v3322_v38  ;;  %v1968_v43 = vrot.slane %v1954_v36, %v3322_v38 }
 0x424   : > { %v2540_v39 = vpop.f32.mrf.mxu1 }
 0x425   : > { %v1969_v40 = vcombine.low %v1950_v34, %v1952_v37  ;;  %v1970_v41 = vcombine.high %v1950_v34, %v1952_v37 }
 0x427   : > { %v1977_v45 = vrot.slane %v1969_v40, %v3322_v38  ;;  %v1984_v46 = vrot.slane %v1970_v41, %v3322_v38 }
 0x429   : > { %v1985_v47 = vcombine.low %v1961_v42, %v1977_v45  ;;  %v1986_v48 = vcombine.high %v1961_v42, %v1977_v45  ;;  %v2001_v49 = vcombine.low %v1968_v43, %v1984_v46  ;;  %v2002_v50 = vcombine.high %v1968_v43, %v1984_v46 }
 0x42b   : > { %v1993_v53 = vrot.slane %v1985_v47, %v3324_v44  ;;  %v2000_v54 = vrot.slane %v1986_v48, %v3324_v44  ;;  %v2009_v55 = vrot.slane %v2001_v49, %v3324_v44  ;;  %v2016_v56 = vrot.slane %v2002_v50, %v3324_v44 }
 0x42d   : > { %v2021_v57 = vcombine.low %v1993_v53, %v2000_v54  ;;  %v2424_v58 = vcombine.high %v1993_v53, %v2000_v54  ;;  %v2037_v59 = vcombine.low %v2009_v55, %v2016_v56  ;;  %v2425_v60 = vcombine.high %v2009_v55, %v2016_v56 }
 0x42f   : > { %v2028_v62 = vrot.slane %v2021_v57, %v3322_v38  ;;  %v2036_v63 = vrot.slane %v2424_v58, %v3322_v38  ;;  %v2044_v1 = vrot.slane %v2037_v59, %v3322_v38  ;;  %v2052_v2 = vrot.slane %v2425_v60, %v3322_v38 }
 0x431   : > { %v2054_v3 = vcombine.high %v2028_v62, %v2036_v63  ;;  %v2070_v4 = vcombine.high %v2044_v1, %v2052_v2  ;;  %v2053_v5 = vcombine.low %v2028_v62, %v2036_v63  ;;  %v2069_v6 = vcombine.low %v2044_v1, %v2052_v2 }
 0x433   : > { %v2068_v7 = vrot.slane %v2054_v3, %v3324_v44  ;;  %v2084_v8 = vrot.slane %v2070_v4, %v3324_v44  ;;  %v2061_v0 = vrot.slane %v2053_v5, %v3324_v44  ;;  %v2077_v9 = vrot.slane %v2069_v6, %v3324_v44 }
 0x435   : > { %v2087_v10 = vcombine.low %v2068_v7, %v2084_v8  ;;  %v2086_v11 = vcombine.high %v2061_v0, %v2077_v9  ;;  %v2085_v12 = vcombine.low %v2061_v0, %v2077_v9  ;;  %v2088_v38 = vcombine.high %v2068_v7, %v2084_v8 }
 0x437   : > { %2094 = vrot.lane.b32.xlu1 %v2087_v10, %s2991_s19  ;;  %2090 = vrot.lane.b32.xlu0 %v2086_v11, %s2992_s18 }
 0x43b   : > { %2098 = vrot.lane.b32.xlu1 %v2088_v38, %s2993_s6 }
 0x4a9   : > { %v2095_v13 = vpop.permute.xlu1 %2094  ;;  %v2091_v26 = vpop.permute.xlu0 %2090 }
 0x4aa   : > { %v2101_v14 = vsel %vm910_vm2, %v2085_v12, %v2091_v26 }
 0x4ab   : > { %v2103_v15 = vsel %vm2102_vm3, %v2101_v14, %v2095_v13 }
 0x4ad   : > { %v2099_v44 = vpop.permute.xlu1 %2098 }
 0x4ae   : > { %v2105_v16 = vsel %vm2104_vm4, %v2103_v15, %v2099_v44 }
 0x4af   : > { %2550 = vmatmul.mubr.msk.f32.vlgmr.msra.gmra.mxu0 %vm606_vm1, %v2105_v16 }
 0x56f   : > { %v2186_v18 = vpop.f32.mrf.mxu0 }
 0x570   : > { %v2187_v19 = vadd.f32 %v2426_v17, %v2186_v18 }
 0x571   : > { %v2551_v20 = vpop.f32.mrf.mxu0 }
 0x572   : > { %2190 = vst.msk [vmem:[%s585_s1] sm:$0xff] %vm606_vm1, %v2187_v19 }
 0x573   : > { %2894 = shalt.err (!%p2891_p8)
}
 0x574   : > { %s2895_s13 = scalar_lea.hbm %s3459_s29, 128  ;;  %s2899_s15 = scalar_lea.hbm %s3572_s16, 256 }
 0x575   : > { %p2896_p6 = scmp.ne.s32.totalorder %s3459_s29, %s2895_s13  ;;  %p2900_p13 = scmp.lt.s32.totalorder %s3459_s29, %s3572_s16 }
 0x576   : > { %p2901_p9 = scmp.lt.s32.totalorder %s2899_s15, %s2895_s13 }
 0x577   : > { %p2897_p3 = pnand %p2896_p6, %p3573_p2 }
 0x578   : > { %p2902_p11 = por %p2901_p9, %p2900_p13 }
 0x579   : > { %p2898_p0 = pneg %p2897_p3 }
 0x57b   : > { %p2903_p12 = pnand %p2902_p11, %p2898_p0 }
 0x57d   : > { %2906 = shalt.err (!%p2903_p12)
}
 0x57e   : > { %2574 = dma.vmem_to_hbm [thread:$0]  (%p3573_p2), %s2207_s20, 128, %s3459_s29, %s2192_s21  }
 0x57f PF: > { %s3574_s6 = sld [smem:[#allocation22_spill]] }
 0x580   : > { %s3575_s12 = sld [smem:[#allocation28_spill]] }
 0x581   : > { %s3576_s28 = sld [smem:[#allocation24_spill]] }
 0x585   : > { %s2218_s27 = sand.u32 1, %s3574_s6  }
 0x586   : > { %p3577_p5 = scmp.ne.s32.totalorder %s3575_s12, 0  ;;  %s2219_s14 = scalar_lea.sflag [#allocation6], %s2218_s27 }
 0x587   : > { %p3578_p10 = scmp.ge.s32.totalorder %s3576_s28, 2 }
 0x589   : > { %p2600_p1 = pnand %p3578_p10, %p3577_p5 }
 0x58b   : > { %p2601_p7 = pneg %p2600_p1 }
 0x58d   : > { %2948 = dma.done.wait (%p2601_p7), %s2219_s14, 128  }
 0x58e   : > { %2950 = vsyncadd (%p2601_p7), %s2219_s14, 4294967168  ;;  %s33_s26 = sadd.s32 1, %s3576_s28   ;;  %s3579_s8 = sld [smem:[#allocation27_spill]] }
 0x58f   : > { %p30_p4 = scmp.ge.s32.totalorder %s33_s26, 4   ;;  %s3580_s24 = sld [smem:[#allocation23_spill]] }
 0x590   : > { %s3581_s25 = sld [smem:[#allocation25_spill]]  ;;  %s3582_s21 = smov %s2957_s22 }
 0x591   : > { %s3583_s22 = smov %s2961_s23  ;;  %32 = sbr.rel (!%p30_p4) target bundleno = 18 (0x12), region = 160 }
 0x594   : > { %s3584_s23 = smov %s3579_s8 }
 0x596   :  { %2224 = vsyncpa [#allocation5], 1 }
 0x597   :  { %2226 = vsyncpa [#allocation5 + $0x1], 1 }
 0x598   :  { %2227 = vsyncpa [#allocation8], 1 }
 0x599   :  { %2229 = vsyncpa [#allocation8 + $0x1], 1 }
 0x59a   :  { %2230 = vsyncpa [#allocation11], 1 }
 0x59b   :  { %2231 = vsyncpa [#allocation14], 1 }
 0x59c   :  { %2232 = vsyncpa [#allocation6], 1 }
 0x59d   :  { %2234 = vsyncpa [#allocation6 + $0x1], 1 }

// kernel: tpu_custom_call.1
= control target key start
LH: loop header
LB: loop body
LE: loop exit
PB: predicated region body
PF: predicated region fallthrough
CT: control target
= control target key end

     0   :  { %s3502_s0 = inlined_call_operand.hbm [shape: f32[2,8,32], index: 0, kind: input, shape index: {}]   ;;  %s3503_s1 = inlined_call_operand.hbm [shape: f32[2,8,32], index: 1, kind: input, shape index: {}]   ;;  %s3504_s2 = inlined_call_operand.hbm [shape: f32[2,8,32], index: 2, kind: input, shape index: {}]   ;;  %s3505_s3 = inlined_call_operand.vmem [shape: f32[2,1,8], index: 3, kind: input, shape index: {}]   ;;  %s3506_s4 = inlined_call_operand.hbm [shape: f32[32,32], index: 4, kind: input, shape index: {}]   ;;  %s3507_s5 = inlined_call_operand.vmem [shape: f32[1,32], index: 5, kind: input, shape index: {}]   ;;  %s3508_s6 = inlined_call_operand.hbm [shape: f32[32,32], index: 6, kind: input, shape index: {}]   ;;  %s3509_s7 = inlined_call_operand.vmem [shape: f32[1,32], index: 7, kind: input, shape index: {}]   ;;  %s3510_s8 = inlined_call_operand.hbm [shape: f32[32,32], index: 8, kind: input, shape index: {}]   ;;  %s3511_s9 = inlined_call_operand.vmem [shape: f32[1,32], index: 9, kind: input, shape index: {}]   ;;  %s3512_s10 = inlined_call_operand.hbm [shape: f32[32,32], index: 10, kind: input, shape index: {}]   ;;  %s3513_s11 = inlined_call_operand.vmem [shape: f32[1,32], index: 11, kind: input, shape index: {}]   ;;  %s3514_s12 = inlined_call_operand.hbm [shape: f32[2,8,32], index: 12, kind: output, shape index: {}]  }
   0x1   :  { %3533 = sst [smem:[#allocation29_spill]] %s3503_s1 }
   0x2   :  { %3534 = sst [smem:[#allocation30_spill]] %s3505_s3 }
   0x3   :  { %3535 = sst [smem:[#allocation31_spill]] %s3506_s4 }
   0x4   :  { %3536 = sst [smem:[#allocation32_spill]] %s3508_s6 }
   0x5   :  { %3537 = sst [smem:[#allocation33_spill]] %s3510_s8 }
   0x6   :  { %3538 = sst [smem:[#allocation34_spill]] %s3513_s11 }
   0x7   :  { %3539 = sst [smem:[#allocation35_spill]] %s3514_s12 }
   0x8   :  { %17 = vsyncpa [#allocation5], 0 }
   0x9   :  { %19 = vsyncpa [#allocation5 + $0x1], 0 }
   0xa   :  { %20 = vsyncpa [#allocation8], 0 }
   0xb   :  { %22 = vsyncpa [#allocation8 + $0x1], 0 }
   0xc   :  { %23 = vsyncpa [#allocation11], 0 }
   0xd   :  { %24 = vsyncpa [#allocation14], 0 }
   0xe   :  { %25 = vsyncpa [#allocation6], 0 }
   0xf   :  { %27 = vsyncpa [#allocation6 + $0x1], 0  ;;  %s3060_s21 = smov 0   ;;  %s3062_s22 = smov 0  }
  0x10   :  { %s3064_s23 = smov 0   ;;  %s3066_s24 = smov 0  }
  0x11   :  { %s3068_s25 = smov 0   ;;  %s3070_s26 = smov 0  }
  0x12 LB: > { %3540 = sst [smem:[#allocation22_spill]] %s2953_s21  ;;  %s3091_s27 = sadd.s32 4294967295, %s2973_s26   ;;  %s2973_s26 = sphi %s3070_s26, %s33_s26   ;;  %s2969_s25 = sphi %s3068_s25, %s3581_s25   ;;  %s2965_s24 = sphi %s3066_s24, %s3580_s24   ;;  %s2961_s23 = sphi %s3064_s23, %s3584_s23   ;;  %s2957_s22 = sphi %s3062_s22, %s3583_s22   ;;  %s2953_s21 = sphi %s3060_s21, %s3582_s21  }
  0x13   : > { %3541 = sst [smem:[#allocation23_spill]] %s2969_s25  ;;  %p2378_p0 = scmp.ge.s32.totalorder %s2973_s26, 1 }
  0x14   : > { %3542 = sst [smem:[#allocation24_spill]] %s2973_s26  ;;  %p3527_p1 = scmp.eq.s32.totalorder %s3091_s27, 0 }
  0x15   : > { %p352_p2 = scmp.lt.s32.totalorder %s2973_s26, 3  ;;  %s2975_s29 = smov [#allocation10]  }
  0x16   : > { %s364_s30 = sshll.u32 %s2975_s29, 4  ;;  %s2976_s14 = smov [#allocation13]   ;;  %s365_s30 = int_to_ptr.vmem [resolvable:$true] %s364_s30 }
  0x17   : > { %p3096_p3 = pnand %p2378_p0, %p352_p2  ;;  %s396_s15 = sshll.u32 %s2976_s14, 4  ;;  %s397_s15 = int_to_ptr.vmem [resolvable:$true] %s396_s15 }
  0x18   : > { %s2704_s16 = scalar_lea.vmem %s365_s30, 512  ;;  %p2712_p11 = scmp.lt.s32.totalorder %s365_s30, %s365_s30 }
  0x19   : > { %p2576_p4 = pneg %p3096_p3  ;;  %p2705_p8 = scmp.ne.s32.totalorder %s365_s30, %s2704_s16 }
  0x1a   : > { %p2713_p12 = scmp.lt.s32.totalorder %s2704_s16, %s2704_s16 }
  0x1b   : > { %p3105_p6 = pnand %p2576_p4, %p3527_p1 }
  0x1c   : > { %p2714_p13 = por %p2713_p12, %p2712_p11 }
  0x1d   : > { %p3528_p7 = pneg %p3105_p6 }
  0x1f   : > { %p2707_p9 = pnand %p2705_p8, %p3528_p7 }
  0x21   : > { %p2708_p10 = pneg %p2707_p9 }
  0x23   : > { %p2715_p0 = pnand %p2714_p13, %p2708_p10 }
  0x25   : > { %2718 = shalt.err (!%p2715_p0)
}
  0x26   : > { %s3515_s17 = smov 128   ;;  %s3517_s18 = smov 8  }
  0x27   : > { %s3545_s4 = sld [smem:[#allocation31_spill]]  ;;  %s2730_s29 = scalar_lea.vmem %s397_s15, 512 }
  0x28   : > { %p2731_p2 = scmp.ne.s32.totalorder %s397_s15, %s2730_s29  ;;  %p2738_p9 = scmp.lt.s32.totalorder %s397_s15, %s397_s15 }
  0x29   : > { %p2739_p10 = scmp.lt.s32.totalorder %s2730_s29, %s2730_s29 }
  0x2a   : > { %p2733_p4 = pnand %p2731_p2, %p3528_p7 }
  0x2b   : > { %p2740_p11 = por %p2739_p10, %p2738_p9 }
  0x2c   : > { %p2734_p8 = pneg %p2733_p4 }
  0x2d   : > { %2579 = dma.hbm_to_vmem [thread:$0]  (!%p3105_p6), %s3545_s4, 512, %s365_s30, [#allocation11], %s3515_s17, %s3515_s17, %s3517_s18  }
  0x2e   : > { %p2741_p12 = pnand %p2740_p11, %p2734_p8 }
  0x30   : > { %2744 = shalt.err (!%p2741_p12)
}
  0x31   : > { %s3546_s8 = sld [smem:[#allocation33_spill]]  ;;  %s2377_s30 = sadd.s32 4294967294, %s2973_s26  }
  0x32   : > { %s45_s19 = sadd.s32 1, %s2969_s25  ;;  %s54_s20 = sadd.s32 1, %s2961_s23 }
  0x33   : > { %p47_p13 = scmp.ge.s32.totalorder %s45_s19, 2  ;;  %p61_p0 = scmp.ne.s32.totalorder %s2961_s23, %s2957_s22 }
  0x34   : > { %p62_p2 = scmp.eq.s32.totalorder %s2973_s26, 0  ;;  %p67_p8 = scmp.ne.s32.totalorder %s2957_s22, %s2953_s21 }
  0x35   : > { %s3586_s19 = smov (%p47_p13, %s45_s19), 0  ;;  %p339_p9 = scmp.eq.s32.totalorder %s3091_s27, 1 }
  0x36   : > { %3547 = sst [smem:[#allocation25_spill]] %s3586_s19  ;;  %p3141_p4 = por %p62_p2, %p61_p0 }
  0x37   : > { %2585 = dma.hbm_to_vmem [thread:$0]  (!%p3105_p6), %s3546_s8, 512, %s397_s15, [#allocation14], %s3515_s17, %s3515_s17, %s3517_s18  }
  0x38   : > { %s49_s15 = ssub.s32 %s2969_s25, %s3586_s19  ;;  %p3152_p11 = por %p3527_p1, %p67_p8 }
  0x39   : > { %p52_p10 = scmp.eq.s32.totalorder %s49_s15, 0  ;;  %p3156_p12 = por %p339_p9, %p61_p0 }
  0x3a   : > { %p345_p13 = scmp.eq.s32.totalorder %s2377_s30, 1  ;;  %p2607_p5 = scmp.lt.s32.totalorder %s2973_s26, 2 }
  0x3b   : > { %s3550_s16 = scalar_select %p3156_p12, 1, 0 }
  0x3c   : > { %s3161_s17 = scalar_select %p52_p10, %s2961_s23, %s54_s20  }
  0x3d   : > { %3551 = sst [smem:[#allocation26_spill]] %s3550_s16  ;;  %p3163_p2 = por %p345_p13, %p67_p8 }
  0x3e   : > { %3552 = sst [smem:[#allocation27_spill]] %s3161_s17  ;;  %s3524_s4 = sand.u32 1, %s2961_s23  }
  0x3f   : > { %s3553_s18 = scalar_select %p3163_p2, 1, 0 }
  0x40   : > { %s3170_s8 = sshll.u32 %s2969_s25, 7  ;;  %s3174_s15 = sshll.u32 %s3524_s4, 3 }
  0x41   : > { %3554 = sst [smem:[#allocation28_spill]] %s3553_s18  ;;  %p3178_p0 = pnand %p2607_p5, %p3141_p4 }
  0x42   : > { %s448_s30 = sand.u32 1, %s2973_s26   ;;  %s3556_s1 = sld [smem:[#allocation29_spill]] }
  0x43   : > { %s452_s21 = scalar_lea.vmem [#allocation7], %s3174_s15  ;;  %s3188_s12 = scalar_lea.sflag [#allocation8], %s448_s30 }
  0x44   : > { %s459_s25 = sshll.u32 %s452_s21, 4  ;;  %p3529_p8 = pneg %p3178_p0  ;;  %s460_s25 = int_to_ptr.vmem [resolvable:$true] %s459_s25 }
  0x45   : > { %s2758_s29 = scalar_lea.vmem %s460_s25, 128  ;;  %s2979_s4 = smov [#allocation7]  }
  0x46   : > { %p2759_p9 = scmp.ne.s32.totalorder %s460_s25, %s2758_s29  ;;  %s2763_s11 = sshll.u32 %s2979_s4, 4  ;;  %s2764_s11 = int_to_ptr.vmem [resolvable:$false] %s2763_s11 }
  0x47   : > { %s2765_s26 = scalar_lea.vmem %s2764_s11, 256  ;;  %p2766_p10 = scmp.lt.s32.totalorder %s460_s25, %s2764_s11 }
  0x48   : > { %s457_s18 = scalar_lea.hbm %s3556_s1, %s3170_s8  ;;  %p2761_p5 = pnand %p2759_p9, %p3529_p8 }
  0x49   : > { %p2767_p13 = scmp.lt.s32.totalorder %s2765_s26, %s2758_s29 }
  0x4a   : > { %p2762_p4 = pneg %p2761_p5 }
  0x4b   : > { %p2768_p1 = por %p2767_p13, %p2766_p10 }
  0x4d   : > { %p2769_p7 = pnand %p2768_p1, %p2762_p4 }
  0x4f   : > { %2772 = shalt.err (!%p2769_p7)
}
  0x50   : > { %2595 = dma.hbm_to_vmem [thread:$0]  (!%p3178_p0), %s457_s18, 128, %s460_s25, %s3188_s12  }
  0x51   : > { %s2980_s21 = smov [#allocation12]   ;;  %s2981_s30 = smov [#allocation15]  }
  0x52   : > { %s380_s17 = sshll.u32 %s2980_s21, 4  ;;  %s412_s20 = sshll.u32 %s2981_s30, 4  ;;  %s381_s17 = int_to_ptr.vmem [resolvable:$true] %s380_s17  ;;  %s413_s20 = int_to_ptr.vmem [resolvable:$true] %s412_s20 }
  0x53   : > { %s2784_s1 = scalar_lea.vmem %s381_s17, 512  ;;  %p3557_p5 = pneg %p3105_p6 }
  0x54   : > { %p2785_p9 = scmp.ne.s32.totalorder %s381_s17, %s2784_s1  ;;  %p2792_p12 = scmp.lt.s32.totalorder %s381_s17, %s381_s17 }
  0x55   : > { %p2793_p10 = scmp.lt.s32.totalorder %s2784_s1, %s2784_s1 }
  0x56   : > { %p2787_p8 = pnand %p2785_p9, %p3557_p5 }
  0x57   : > { %p2794_p1 = por %p2793_p10, %p2792_p12 }
  0x58   : > { %p2788_p2 = pneg %p2787_p8 }
  0x5a   : > { %p2795_p7 = pnand %p2794_p1, %p2788_p2 }
  0x5c   : > { %2798 = shalt.err (!%p2795_p7)
}
  0x5d   : > { %s3558_s4 = smov 8   ;;  %s3559_s11 = smov 128  }
  0x5e   : > { %s3560_s6 = sld [smem:[#allocation32_spill]]  ;;  %s2810_s18 = scalar_lea.vmem %s413_s20, 512 }
  0x5f   : > { %p2811_p4 = scmp.ne.s32.totalorder %s413_s20, %s2810_s18  ;;  %p3561_p8 = pmov %p3557_p5 }
  0x60   : > { %p2818_p12 = scmp.lt.s32.totalorder %s413_s20, %s413_s20  ;;  %p2819_p2 = scmp.lt.s32.totalorder %s2810_s18, %s2810_s18 }
  0x61   : > { %p2813_p13 = pnand %p2811_p4, %p3561_p8 }
  0x62   : > { %p2820_p5 = por %p2819_p2, %p2818_p12 }
  0x63   : > { %p2814_p9 = pneg %p2813_p13 }
  0x64   : > { %2582 = dma.hbm_to_vmem [thread:$0]  (!%p3105_p6), %s3560_s6, 512, %s381_s17, [#allocation11], %s3559_s11, %s3559_s11, %s3558_s4  }
  0x65   : > { %p2821_p10 = pnand %p2820_p5, %p2814_p9 }
  0x67   : > { %2824 = shalt.err (!%p2821_p10)
}
  0x68   : > { %2588 = dma.hbm_to_vmem [thread:$0]  (!%p3105_p6), %s3512_s10, 512, %s413_s20, [#allocation14], %s3559_s11, %s3559_s11, %s3558_s4  }
  0x69   : > { %s439_s30 = scalar_lea.hbm %s3502_s0, %s3170_s8  ;;  %s433_s25 = scalar_lea.vmem [#allocation4], %s3174_s15 }
  0x6a   : > { %s441_s26 = sshll.u32 %s433_s25, 4  ;;  %s475_s6 = scalar_lea.hbm %s3504_s2, %s3170_s8  ;;  %s442_s26 = int_to_ptr.vmem [resolvable:$true] %s441_s26 }
  0x6b   : > { %s3562_s16 = sand.u32 1, %s2961_s23   ;;  %s2838_s1 = scalar_lea.vmem %s442_s26, 128 }
  0x6c   : > { %s430_s3 = scalar_lea.sflag [#allocation5], %s3562_s16  ;;  %p2839_p1 = scmp.ne.s32.totalorder %s442_s26, %s2838_s1 }
  0x6d   : > { %p3563_p7 = pneg %p3178_p0  ;;  %s2982_s20 = smov [#allocation4]  }
  0x6e   : > { %s2843_s4 = sshll.u32 %s2982_s20, 4  ;;  %s2844_s4 = int_to_ptr.vmem [resolvable:$false] %s2843_s4 }
  0x6f   : > { %p2841_p4 = pnand %p2839_p1, %p3563_p7  ;;  %s2845_s11 = scalar_lea.vmem %s2844_s4, 256 }
  0x70   : > { %p2846_p6 = scmp.lt.s32.totalorder %s442_s26, %s2844_s4  ;;  %p2847_p13 = scmp.lt.s32.totalorder %s2845_s11, %s2838_s1 }
  0x71   : > { %p2842_p8 = pneg %p2841_p4 }
  0x72   : > { %p2848_p9 = por %p2847_p13, %p2846_p6 }
  0x74   : > { %p2849_p12 = pnand %p2848_p9, %p2842_p8 }
  0x76   : > { %2852 = shalt.err (!%p2849_p12)
}
  0x77   : > { %2592 = dma.hbm_to_vmem [thread:$0]  (!%p3178_p0), %s439_s30, 128, %s442_s26, %s430_s3  }
  0x78   : > { %s470_s16 = scalar_lea.vmem [#allocation9], %s3174_s15  ;;  %p3564_p5 = pmov %p3563_p7 }
  0x79   : > { %s477_s29 = sshll.u32 %s470_s16, 4  ;;  %s2983_s17 = smov [#allocation9]   ;;  %s478_s29 = int_to_ptr.vmem [resolvable:$true] %s477_s29 }
  0x7a   : > { %s2866_s21 = scalar_lea.vmem %s478_s29, 128  ;;  %s2871_s25 = sshll.u32 %s2983_s17, 4  ;;  %s2872_s25 = int_to_ptr.vmem [resolvable:$false] %s2871_s25 }
  0x7b   : > { %p2867_p2 = scmp.ne.s32.totalorder %s478_s29, %s2866_s21  ;;  %s2873_s13 = scalar_lea.vmem %s2872_s25, 256 }
  0x7c   : > { %p2874_p7 = scmp.lt.s32.totalorder %s478_s29, %s2872_s25  ;;  %p2875_p4 = scmp.lt.s32.totalorder %s2873_s13, %s2866_s21 }
  0x7d   : > { %p2869_p10 = pnand %p2867_p2, %p3564_p5 }
  0x7e   : > { %p2876_p8 = por %p2875_p4, %p2874_p7 }
  0x7f   : > { %p2870_p1 = pneg %p2869_p10 }
  0x81   : > { %p2877_p6 = pnand %p2876_p8, %p2870_p1 }
  0x83   : > { %2880 = shalt.err (!%p2877_p6)
}
  0x84   : > { %2598 = dma.hbm_to_vmem [thread:$0]  (!%p3178_p0), %s475_s6, 128, %s478_s29, %s3188_s12  }
  0x85   : > { %492 = sbr.rel (%p3096_p3) target bundleno = 1407 (0x57f), region = 68  ;;  %s3251_s30 = sand.u32 (!%p3096_p3), 1, %s2957_s22  }
  0x86   : > { %s3254_s26 = sshll.u32 (!%p3096_p3), %s3251_s30, 3  ;;  %s495_s19 = scalar_lea.sflag (!%p3096_p3), [#allocation5], %s3251_s30 }
  0x87   : > { %s498_s18 = scalar_lea.vmem (!%p3096_p3), [#allocation4], %s3254_s26 }
  0x8a   : > { %2932 = dma.done.wait (%p3152_p11), %s495_s19, 128  }
  0x8b   : > { %2934 = vsyncadd (%p3152_p11), %s495_s19, 4294967168  ;;  %s503_s6 = sand.u32 1, %s3091_s27   ;;  %s507_s12 = scalar_lea.vmem [#allocation7], %s3254_s26 }
  0x8c   : > { %s504_s8 = scalar_lea.sflag [#allocation8], %s503_s6 }
  0x8d   : > { %2936 = dma.done.wait (%p3152_p11), %s504_s8, 256  }
  0x8e   : > { %2938 = vsyncadd (%p3152_p11), %s504_s8, 4294967040  ;;  %s516_s28 = scalar_lea.vmem [#allocation9], %s3254_s26  ;;  %p3565_p3 = scmp.eq.s32.totalorder %s3091_s27, 0 }
  0x90   : > { %2940 = dma.done.wait (%p3565_p3), [#allocation11], 1024   ;;  %p3566_p0 = pmov %p3565_p3 }
  0x92   : > { %2942 = vsyncadd (%p3566_p0), [#allocation11], 4294966272  ;;  %p3567_p13 = pmov %p3566_p0 }
  0x93   : > { %p3568_p9 = pmov %p3566_p0 }
  0x94   : > { %2944 = dma.done.wait (%p3567_p13), [#allocation14], 1024  }
  0x95   : > { %2946 = vsyncadd (%p3568_p9), [#allocation14], 4294966272  ;;  %v2984_v0 = vmov 0.0   ;;  %vm2985_vm0 = vmmov 0   ;;  %v598_v1 = vld [vmem:[#allocation12 + $0x18] sm:$0xff]  ;;  %v597_v2 = vld [vmem:[#allocation12 + $0x10] sm:$0xff]  ;;  %v779_v30 = vlaneseq }
  0x96   : > { %2468 = vmatprep.subr.mxu0 %v2984_v0  ;;  %2476 = vmatprep.mubr.msk.f32.mxu0 %vm2985_vm0, %v2984_v0  ;;  %v596_v3 = vld [vmem:[#allocation12 + $0x8] sm:$0xff]  ;;  %v683_v4 = vld [vmem:[#allocation13 + $0x18] sm:$0xff]  ;;  %v595_v5 = vld [vmem:[#allocation12] sm:$0xff]  ;;  %vm606_vm1 = vcmask 261120   ;;  %s2986_s1 = smov 104   ;;  %s2987_s20 = smov 120  }
  0x97   : > { %2479 = vmatprep.subr.mxu1 %v2984_v0  ;;  %2487 = vmatprep.mubr.msk.f32.mxu1 %vm2985_vm0, %v2984_v0  ;;  %v593_v6 = vld [vmem:[%s507_s12] sm:$0xff]  ;;  %v1069_v7 = vld [vmem:[#allocation10 + $0x18] sm:$0xff]  ;;  %v1068_v8 = vld [vmem:[#allocation10 + $0x10] sm:$0xff]  ;;  %s2988_s16 = smov 112   ;;  %v2989_v28 = vmov 1983009808  }
  0x98   : > { %2469 = vmatpush3.msra.mxu0 %v598_v1  ;;  %2480 = vmatpush3.msra.mxu1 %v683_v4  ;;  %v1067_v9 = vld [vmem:[#allocation10 + $0x8] sm:$0xff]  ;;  %v1066_v10 = vld [vmem:[#allocation10] sm:$0xff]  ;;  %v1065_v11 = vld [vmem:[%s498_s18] sm:$0xff]  ;;  %v777_v29 = vunpack.c.l.s4 %v2989_v28  ;;  %v2990_v31 = vmov 1934713408   ;;  %v780_v34 = vshrl.u32 %v779_v30, 7 }
  0x99   : > { %2470 = vmatprep.subr.mxu0 %v2984_v0  ;;  %2481 = vmatprep.subr.mxu1 %v2984_v0  ;;  %v682_v12 = vld [vmem:[#allocation13 + $0x10] sm:$0xff]  ;;  %v681_v13 = vld [vmem:[#allocation13 + $0x8] sm:$0xff]  ;;  %v680_v14 = vld [vmem:[#allocation13] sm:$0xff]  ;;  %v809_v32 = vunpack.c.l.s4 %v2990_v31  ;;  %vm910_vm2 = vcmask 64512   ;;  %p586_p11 = scmp.lt.s32.totalorder %s2965_s24, 1  ;;  %s3569_s3 = sld [smem:[#allocation30_spill]] }
  0x9a   : > { %2471 = vmatpush3.msra.mxu0 %v597_v2  ;;  %2482 = vmatpush3.msra.mxu1 %v682_v12  ;;  %v594_v15 = vld [vmem:[%s516_s28] sm:$0xff]  ;;  %v778_v33 = vunpack.c.0.s8 %v777_v29  ;;  %s2991_s19 = smov 16   ;;  %s2992_s18 = smov 8   ;;  %vm2102_vm3 = vcmask 130048   ;;  %vm2104_vm4 = vcmask 195584  }
  0x9b   : > { %2472 = vmatprep.subr.mxu0 %v2984_v0  ;;  %2483 = vmatprep.subr.mxu1 %v2984_v0  ;;  %v2399_v16 = vld [vmem:[%s3509_s7] ss:$0 sm:$0xff]  ;;  %v810_v37 = vunpack.c.0.s8 %v809_v32  ;;  %s587_s17 = scalar_select %p586_p11, %s2965_s24, 1 }
  0x9c   : > { %2473 = vmatpush3.msra.mxu0 %v596_v3  ;;  %2484 = vmatpush3.msra.mxu1 %v681_v13  ;;  %v2407_v20 = vld [vmem:[%s3507_s5] ss:$0 sm:$0xff]  ;;  %v3322_v38 = vsub.s32 %v778_v33, %v780_v34  ;;  %s2993_s6 = smov 24   ;;  %s3570_s8 = sld [smem:[#allocation26_spill]] }
  0x9d   : > { %2474 = vmatprep.subr.mxu0 %v2984_v0  ;;  %2485 = vmatprep.subr.mxu1 %v2984_v0  ;;  %v2401_v24 = vld [vmem:[%s3511_s9] ss:$0 sm:$0xff]  ;;  %v3324_v44 = vsub.s32 %v810_v37, %v780_v34  ;;  %s3571_s27 = sld [smem:[#allocation34_spill]]  ;;  %s2429_s14 = sshll.u32 %s2965_s24, 7 }
  0x9e   : > { %2475 = vmatpush3.msra.mxu0 %v595_v5  ;;  %2486 = vmatpush3.msra.mxu1 %v680_v14  ;;  %s2192_s21 = scalar_lea.sflag [#allocation6], %s3251_s30  ;;  %s2994_s24 = smov [#allocation16]  }
  0x9f   : > { %2477 = vmatmul.mubr.msk.f32.vlgmr.msra.gmra.mxu0 %vm606_vm1, %v593_v6  ;;  %2490 = vmatprep.subr.mxu0 %v2984_v0  ;;  %s588_s15 = scalar_lea.vmem %s3569_s3, %s587_s17 }
  0xa0   : > { %2491 = vmatpush3.msra.mxu0 %v1069_v7  ;;  %2498 = vmatprep.mubr.msk.f32.mxu0 %vm2985_vm0, %v2984_v0 }
  0xa1   : > { %2492 = vmatprep.subr.mxu0 %v2984_v0  ;;  %2488 = vmatmul.mubr.msk.f32.vlgmr.msra.gmra.mxu1 %vm606_vm1, %v594_v15 }
  0xa2   : > { %2493 = vmatpush3.msra.mxu0 %v1068_v8  ;;  %2501 = vmatprep.subr.mxu1 %v2984_v0  ;;  %p3573_p2 = scmp.ne.s32.totalorder %s3570_s8, 0 }
  0xa3   : > { %2494 = vmatprep.subr.mxu0 %v2984_v0  ;;  %2503 = vmatprep.mubr.msk.f32.mxu1 %vm2985_vm0, %v2984_v0 }
  0xa4   : > { %2495 = vmatpush3.msra.mxu0 %v1067_v9 }
  0xa5   : > { %2496 = vmatprep.subr.mxu0 %v2984_v0 }
  0xa6   : > { %2497 = vmatpush3.msra.mxu0 %v1066_v10 }
  0xa7   : > { %2499 = vmatmul.mubr.msk.f32.vlgmr.msra.gmra.mxu0 %vm606_vm1, %v1065_v11  ;;  %2521 = vmatprep.subr.mxu0 %v2984_v0 }
  0xa8   : > { %2523 = vmatprep.mubr.msk.f32.mxu0 %vm2985_vm0, %v2984_v0 }
 0x15f   : > { %v676_v17 = vpop.f32.mrf.mxu0 }
 0x160   : > { %v677_v18 = vadd.f32 %v2399_v16, %v676_v17 }
 0x161   : > { %v2478_v19 = vpop.f32.mrf.mxu0  ;;  %v760_v25 = vpop.f32.mrf.mxu1 }
 0x162   : > { %771 = vrot.lane.b32.xlu1 %v677_v18, %s2986_s1  ;;  %765 = vrot.lane.b32.xlu0 %v677_v18, %s2987_s20  ;;  %v3317_v26 = vadd.f32 %v2401_v24, %v760_v25 }
 0x163   : > { %v2489_v27 = vpop.f32.mrf.mxu1 }
 0x166   : > { %768 = vrot.lane.b32.xlu0 %v677_v18, %s2988_s16 }
 0x167   : > { %v1147_v21 = vpop.f32.mrf.mxu0 }
 0x168   : > { %v1148_v22 = vadd.f32 %v2407_v20, %v1147_v21 }
 0x169   : > { %v2500_v23 = vpop.f32.mrf.mxu0 }
 0x16a   : > { %1155 = vrot.lane.b32.xlu0 %v1148_v22, %s2988_s16  ;;  %1152 = vrot.lane.b32.xlu1 %v1148_v22, %s2987_s20 }
 0x16e   : > { %1158 = vrot.lane.b32.xlu1 %v1148_v22, %s2986_s1  ;;  %916 = vrot.lane.b32.xlu0 %v3317_v26, %s2987_s20 }
 0x172   : > { %919 = vrot.lane.b32.xlu1 %v3317_v26, %s2988_s16  ;;  %922 = vrot.lane.b32.xlu0 %v3317_v26, %s2986_s1  ;;  %s585_s1 = scalar_lea.vmem [#allocation16], %s3254_s26  ;;  %s3572_s16 = sld [smem:[#allocation35_spill]] }
 0x173   : > { %s2206_s20 = sshll.u32 %s585_s1, 4  ;;  %s2885_s26 = sshll.u32 %s2994_s24, 4  ;;  %s2207_s20 = int_to_ptr.vmem [resolvable:$true] %s2206_s20  ;;  %s2886_s26 = int_to_ptr.vmem [resolvable:$false] %s2885_s26 }
 0x174   : > { %s2881_s17 = scalar_lea.vmem %s2207_s20, 128  ;;  %s2887_s25 = scalar_lea.vmem %s2886_s26, 256 }
 0x175   : > { %p2882_p12 = scmp.ne.s32.totalorder %s2207_s20, %s2881_s17  ;;  %p2888_p1 = scmp.lt.s32.totalorder %s2207_s20, %s2886_s26 }
 0x176   : > { %p2889_p7 = scmp.lt.s32.totalorder %s2887_s25, %s2881_s17 }
 0x177   : > { %p2883_p5 = pnand %p2882_p12, %p3573_p2 }
 0x178   : > { %s3459_s29 = scalar_lea.hbm %s3572_s16, %s2429_s14  ;;  %p2890_p4 = por %p2889_p7, %p2888_p1 }
 0x179   : > { %p2884_p10 = pneg %p2883_p5 }
 0x17b   : > { %p2891_p8 = pnand %p2890_p4, %p2884_p10 }
 0x1d4   : > { %v772_v35 = vpop.permute.xlu1 %771  ;;  %v766_v36 = vpop.permute.xlu0 %765 }
 0x1d5   : > { %v790_v39 = vcombine.low %v766_v36, %v772_v35  ;;  %v791_v40 = vcombine.high %v766_v36, %v772_v35 }
 0x1d7   : > { %v798_v45 = vrot.slane %v790_v39, %v3322_v38  ;;  %v805_v46 = vrot.slane %v791_v40, %v3322_v38 }
 0x1d8   : > { %v769_v41 = vpop.permute.xlu0 %768 }
 0x1d9   : > { %v774_v42 = vcombine.low %v677_v18, %v769_v41  ;;  %v775_v43 = vcombine.high %v677_v18, %v769_v41 }
 0x1db   : > { %v782_v47 = vrot.slane %v774_v42, %v3322_v38  ;;  %v789_v48 = vrot.slane %v775_v43, %v3322_v38 }
 0x1dc   : > { %v1153_v49 = vpop.permute.xlu1 %1152  ;;  %v1156_v54 = vpop.permute.xlu0 %1155 }
 0x1dd   : > { %v806_v50 = vcombine.low %v782_v47, %v798_v45  ;;  %v807_v51 = vcombine.high %v782_v47, %v798_v45  ;;  %v822_v52 = vcombine.low %v789_v48, %v805_v46  ;;  %v823_v53 = vcombine.high %v789_v48, %v805_v46 }
 0x1de   : > { %v1161_v59 = vcombine.low %v1148_v22, %v1156_v54  ;;  %v1162_v60 = vcombine.high %v1148_v22, %v1156_v54 }
 0x1df   : > { %v814_v55 = vrot.slane %v806_v50, %v3324_v44  ;;  %v821_v56 = vrot.slane %v807_v51, %v3324_v44  ;;  %v830_v57 = vrot.slane %v822_v52, %v3324_v44  ;;  %v837_v58 = vrot.slane %v823_v53, %v3324_v44 }
 0x1e0   : > { %v1159_v61 = vpop.permute.xlu1 %1158  ;;  %v1169_v9 = vrot.slane %v1161_v59, %v3322_v38  ;;  %v1176_v10 = vrot.slane %v1162_v60, %v3322_v38  ;;  %v917_v60 = vpop.permute.xlu0 %916 }
 0x1e1   : > { %v842_v62 = vcombine.low %v814_v55, %v821_v56  ;;  %v2403_v63 = vcombine.high %v814_v55, %v821_v56  ;;  %v858_v1 = vcombine.low %v830_v57, %v837_v58  ;;  %v2404_v2 = vcombine.high %v830_v57, %v837_v58 }
 0x1e2   : > { %v1177_v3 = vcombine.low %v1153_v49, %v1159_v61  ;;  %v1178_v4 = vcombine.high %v1153_v49, %v1159_v61 }
 0x1e3   : > { %v849_v5 = vrot.slane %v842_v62, %v3322_v38  ;;  %v857_v6 = vrot.slane %v2403_v63, %v3322_v38  ;;  %v865_v7 = vrot.slane %v858_v1, %v3322_v38  ;;  %v873_v8 = vrot.slane %v2404_v2, %v3322_v38 }
 0x1e4   : > { %v1185_v11 = vrot.slane %v1177_v3, %v3322_v38  ;;  %v1192_v12 = vrot.slane %v1178_v4, %v3322_v38  ;;  %v920_v61 = vpop.permute.xlu1 %919  ;;  %v923_v1 = vpop.permute.xlu0 %922 }
 0x1e5   : > { %v874_v13 = vcombine.low %v849_v5, %v857_v6  ;;  %v875_v14 = vcombine.high %v849_v5, %v857_v6  ;;  %v890_v15 = vcombine.low %v865_v7, %v873_v8  ;;  %v891_v16 = vcombine.high %v865_v7, %v873_v8 }
 0x1e6   : > { %v1193_v17 = vcombine.low %v1169_v9, %v1185_v11  ;;  %v1194_v18 = vcombine.high %v1169_v9, %v1185_v11  ;;  %v1209_v19 = vcombine.low %v1176_v10, %v1192_v12  ;;  %v1210_v20 = vcombine.high %v1176_v10, %v1192_v12 }
 0x1e7   : > { %v882_v21 = vrot.slane %v874_v13, %v3324_v44  ;;  %v889_v22 = vrot.slane %v875_v14, %v3324_v44  ;;  %v898_v23 = vrot.slane %v890_v15, %v3324_v44  ;;  %v905_v24 = vrot.slane %v891_v16, %v3324_v44 }
 0x1e8   : > { %v1201_v25 = vrot.slane %v1193_v17, %v3324_v44  ;;  %v1208_v27 = vrot.slane %v1194_v18, %v3324_v44  ;;  %v1217_v28 = vrot.slane %v1209_v19, %v3324_v44  ;;  %v1224_v29 = vrot.slane %v1210_v20, %v3324_v44 }
 0x1e9   : > { %v906_v30 = vcombine.low %v882_v21, %v898_v23  ;;  %v907_v31 = vcombine.high %v882_v21, %v898_v23  ;;  %v908_v32 = vcombine.low %v889_v22, %v905_v24  ;;  %v909_v33 = vcombine.high %v889_v22, %v905_v24 }
 0x1ea   : > { %v1229_v34 = vcombine.low %v1201_v25, %v1208_v27  ;;  %v2409_v35 = vcombine.high %v1201_v25, %v1208_v27  ;;  %v1245_v36 = vcombine.low %v1217_v28, %v1224_v29  ;;  %v2410_v37 = vcombine.high %v1217_v28, %v1224_v29 }
 0x1eb   : > { %911 = vst.msk [vmem:[#allocation2] sm:$0xff] %vm910_vm2, %v906_v30  ;;  %912 = vst.msk [vmem:[#allocation2 + $0x8] sm:$0xff] %vm910_vm2, %v907_v31  ;;  %v925_v62 = vcombine.low %v3317_v26, %v920_v61  ;;  %v926_v63 = vcombine.high %v3317_v26, %v920_v61  ;;  %v941_v2 = vcombine.low %v917_v60, %v923_v1 }
 0x1ec   : > { %913 = vst.msk [vmem:[#allocation2 + $0x10] sm:$0xff] %vm910_vm2, %v908_v32  ;;  %914 = vst.msk [vmem:[#allocation2 + $0x18] sm:$0xff] %vm910_vm2, %v909_v33  ;;  %v1236_v39 = vrot.slane %v1229_v34, %v3322_v38  ;;  %v1244_v40 = vrot.slane %v2409_v35, %v3322_v38  ;;  %v1252_v41 = vrot.slane %v1245_v36, %v3322_v38 }
 0x1ed   : > { %v1260_v42 = vrot.slane %v2410_v37, %v3322_v38  ;;  %v942_v3 = vcombine.high %v917_v60, %v923_v1  ;;  %v933_v4 = vrot.slane %v925_v62, %v3322_v38  ;;  %v940_v5 = vrot.slane %v926_v63, %v3322_v38 }
 0x1ee   : > { %v1261_v43 = vcombine.low %v1236_v39, %v1244_v40  ;;  %v1262_v49 = vcombine.high %v1236_v39, %v1244_v40  ;;  %v949_v6 = vrot.slane %v941_v2, %v3322_v38  ;;  %v2411_v39 = vld [vmem:[%s588_s15] ss:$0 sm:$0xff] }
 0x1ef   : > { %v1277_v45 = vcombine.low %v1252_v41, %v1260_v42  ;;  %v1278_v50 = vcombine.high %v1252_v41, %v1260_v42  ;;  %v956_v7 = vrot.slane %v942_v3, %v3322_v38 }
 0x1f0   : > { %v1269_v46 = vrot.slane %v1261_v43, %v3324_v44  ;;  %v1276_v54 = vrot.slane %v1262_v49, %v3324_v44  ;;  %v957_v8 = vcombine.low %v933_v4, %v949_v6  ;;  %v958_v9 = vcombine.high %v933_v4, %v949_v6 }
 0x1f1   : > { %v1285_v47 = vrot.slane %v1277_v45, %v3324_v44  ;;  %v1292_v55 = vrot.slane %v1278_v50, %v3324_v44  ;;  %v973_v10 = vcombine.low %v940_v5, %v956_v7  ;;  %v974_v11 = vcombine.high %v940_v5, %v956_v7 }
 0x1f2   : > { %v1298_v48 = vld [vmem:[#allocation2] sm:$0xff]  ;;  %v1299_v52 = vld [vmem:[#allocation2 + $0x8] sm:$0xff]  ;;  %v965_v12 = vrot.slane %v957_v8, %v3324_v44  ;;  %v972_v13 = vrot.slane %v958_v9, %v3324_v44 }
 0x1f3   : > { %2502 = vmatpush3.xpose.msk.msra.mxu1 %vm910_vm2, %v1298_v48  ;;  %v1293_v51 = vcombine.low %v1269_v46, %v1285_v47  ;;  %v1294_v53 = vcombine.high %v1269_v46, %v1285_v47  ;;  %v1300_v56 = vld [vmem:[#allocation2 + $0x10] sm:$0xff]  ;;  %v1295_v57 = vcombine.low %v1276_v54, %v1292_v55  ;;  %v1301_v58 = vld [vmem:[#allocation2 + $0x18] sm:$0xff]  ;;  %v1296_v59 = vcombine.high %v1276_v54, %v1292_v55 }
 0x1f4   : > { %2506 = vmatprep.subr.mxu1 %v2984_v0  ;;  %v981_v26 = vrot.slane %v973_v10, %v3324_v44  ;;  %v988_v14 = vrot.slane %v974_v11, %v3324_v44  ;;  %v993_v15 = vcombine.low %v965_v12, %v972_v13  ;;  %v2405_v16 = vcombine.high %v965_v12, %v972_v13 }
 0x1f6   : > { %2504 = vmatmul.mubr.msk.f32.vlgmr.msra.gmra.mxu1 %vm910_vm2, %v1293_v51  ;;  %v1009_v17 = vcombine.low %v981_v26, %v988_v14  ;;  %v2406_v18 = vcombine.high %v981_v26, %v988_v14  ;;  %v1000_v19 = vrot.slane %v993_v15, %v3322_v38  ;;  %v1008_v20 = vrot.slane %v2405_v16, %v3322_v38  ;;  %v2109_v15 = vld [vmem:[#allocation15 + $0x18] sm:$0xff] }
 0x1f7   : > { %2507 = vmatpush3.xpose.msk.msra.mxu1 %vm910_vm2, %v1299_v52  ;;  %2508 = vmatprep.mubr.msk.f32.mxu1 %vm2985_vm0, %v2984_v0 }
 0x1f8   : > { %2511 = vmatprep.subr.mxu1 %v2984_v0  ;;  %v1016_v21 = vrot.slane %v1009_v17, %v3322_v38  ;;  %v1024_v22 = vrot.slane %v2406_v18, %v3322_v38  ;;  %v1025_v23 = vcombine.low %v1000_v19, %v1008_v20  ;;  %v1026_v24 = vcombine.high %v1000_v19, %v1008_v20 }
 0x1fa   : > { %2509 = vmatmul.mubr.msk.f32.vlgmr.msra.gmra.mxu1 %vm910_vm2, %v1294_v53  ;;  %v1041_v25 = vcombine.low %v1016_v21, %v1024_v22  ;;  %v1042_v27 = vcombine.high %v1016_v21, %v1024_v22  ;;  %v1033_v28 = vrot.slane %v1025_v23, %v3324_v44  ;;  %v1040_v29 = vrot.slane %v1026_v24, %v3324_v44 }
 0x1fb   : > { %2512 = vmatpush3.xpose.msk.msra.mxu1 %vm910_vm2, %v1300_v56  ;;  %2513 = vmatprep.mubr.msk.f32.mxu1 %vm2985_vm0, %v2984_v0 }
 0x1fc   : > { %2516 = vmatprep.subr.mxu1 %v2984_v0  ;;  %v1049_v30 = vrot.slane %v1041_v25, %v3324_v44  ;;  %v1056_v31 = vrot.slane %v1042_v27, %v3324_v44 }
 0x1fe   : > { %2514 = vmatmul.mubr.msk.f32.vlgmr.msra.gmra.mxu1 %vm910_vm2, %v1295_v57  ;;  %v1057_v32 = vcombine.low %v1033_v28, %v1049_v30  ;;  %v1058_v33 = vcombine.high %v1033_v28, %v1049_v30  ;;  %v1059_v34 = vcombine.low %v1040_v29, %v1056_v31  ;;  %v1060_v35 = vcombine.high %v1040_v29, %v1056_v31 }
 0x1ff   : > { %2517 = vmatpush3.xpose.msk.msra.mxu1 %vm910_vm2, %v1301_v58  ;;  %2518 = vmatprep.mubr.msk.f32.mxu1 %vm2985_vm0, %v2984_v0 }
 0x200   : > { %2526 = vmatprep.subr.mxu1 %v2984_v0  ;;  %1061 = vst.msk [vmem:[#allocation3] sm:$0xff] %vm910_vm2, %v1057_v32  ;;  %1062 = vst.msk [vmem:[#allocation3 + $0x8] sm:$0xff] %vm910_vm2, %v1058_v33 }
 0x201   : > { %1063 = vst.msk [vmem:[#allocation3 + $0x10] sm:$0xff] %vm910_vm2, %v1059_v34  ;;  %1064 = vst.msk [vmem:[#allocation3 + $0x18] sm:$0xff] %vm910_vm2, %v1060_v35 }
 0x202   : > { %2519 = vmatmul.mubr.msk.f32.vlgmr.msra.gmra.mxu1 %vm910_vm2, %v1296_v59 }
 0x203   : > { %2528 = vmatprep.mubr.msk.f32.mxu1 %vm2985_vm0, %v2984_v0 }
 0x207   : > { %v1302_v36 = vld [vmem:[#allocation3] sm:$0xff]  ;;  %v1303_v37 = vld [vmem:[#allocation3 + $0x8] sm:$0xff] }
 0x208   : > { %2522 = vmatpush3.msra.mxu0 %v1302_v36  ;;  %2527 = vmatpush3.msra.mxu1 %v1303_v37  ;;  %v1304_v7 = vld [vmem:[#allocation3 + $0x10] sm:$0xff]  ;;  %v1305_v10 = vld [vmem:[#allocation3 + $0x18] sm:$0xff] }
 0x209   : > { %2531 = vmatprep.subr.mxu0 %v2984_v0  ;;  %2536 = vmatprep.subr.mxu1 %v2984_v0 }
 0x2b6   : > { %v1385_v40 = vpop.f32.mrf.mxu1 }
 0x2b7   : > { %v1386_v41 = vadd.f32 %v2411_v39, %v1385_v40 }
 0x2b8   : > { %v2505_v42 = vpop.f32.mrf.mxu1 }
 0x2b9   : > { %v1617_v43 = vsel %vm910_vm2, %v1386_v41, -inf }
 0x2ba   : > { %1618 = vmax.xlane.f32.xlu0 %v1617_v43  ;;  %v1461_v45 = vpop.f32.mrf.mxu1 }
 0x2bb   : > { %v1462_v46 = vadd.f32 %v2411_v39, %v1461_v45 }
 0x2bc   : > { %v2510_v47 = vpop.f32.mrf.mxu1 }
 0x2bd   : > { %v1620_v48 = vsel %vm910_vm2, %v1462_v46, -inf }
 0x2be   : > { %1621 = vmax.xlane.f32.xlu1 %v1620_v48  ;;  %v1537_v49 = vpop.f32.mrf.mxu1 }
 0x2bf   : > { %v1538_v50 = vadd.f32 %v2411_v39, %v1537_v49 }
 0x2c0   : > { %v2515_v51 = vpop.f32.mrf.mxu1 }
 0x2c1   : > { %v1623_v52 = vsel %vm910_vm2, %v1538_v50, -inf  ;;  %v2108_v51 = vld [vmem:[#allocation15 + $0x10] sm:$0xff] }
 0x2c2   : > { %1624 = vmax.xlane.f32.xlu1 %v1623_v52  ;;  %v1613_v53 = vpop.f32.mrf.mxu1  ;;  %v2107_v52 = vld [vmem:[#allocation15 + $0x8] sm:$0xff] }
 0x2c3   : > { %v1614_v54 = vadd.f32 %v2411_v39, %v1613_v53 }
 0x2c4   : > { %v2520_v55 = vpop.f32.mrf.mxu1 }
 0x2c5   : > { %v1626_v56 = vsel %vm910_vm2, %v1614_v54, -inf }
 0x2c6   : > { %1627 = vmax.xlane.f32.xlu0 %v1626_v56 }
 0x343   : > { %v1619_v57 = vpop.xlane.xlu0 %1618 }
 0x344   : > { %v1629_v58 = vsub.f32 %v1386_v41, %v1619_v57 }
 0x346   : > { %v1633_v59 = vmul.f32 1.442695, %v1629_v58 }
 0x347   : > { %v1622_v60 = vpop.xlane.xlu1 %1621 }
 0x348   : > { %2677 = vpow2.f32 %v1633_v59  ;;  %v1630_v61 = vsub.f32 %v1462_v46, %v1622_v60 }
 0x34a   : > { %v1635_v62 = vmul.f32 1.442695, %v1630_v61  ;;  %v2106_v61 = vld [vmem:[#allocation15] sm:$0xff] }
 0x34b   : > { %v1625_v63 = vpop.xlane.xlu1 %1624 }
 0x34c   : > { %2679 = vpow2.f32 %v1635_v62  ;;  %v1631_v1 = vsub.f32 %v1538_v50, %v1625_v63 }
 0x34e   : > { %v1637_v2 = vmul.f32 1.442695, %v1631_v1 }
 0x34f   : > { %v1628_v3 = vpop.xlane.xlu0 %1627 }
 0x350   : > { %2681 = vpow2.f32 %v1637_v2  ;;  %v1632_v4 = vsub.f32 %v1614_v54, %v1628_v3 }
 0x352   : > { %v1639_v5 = vmul.f32 1.442695, %v1632_v4 }
 0x354   : > { %2683 = vpow2.f32 %v1639_v5 }
 0x355   : > { %v2678_v6 = vpop.eup %2677 }
 0x356   : > { %2524 = vmatmul.mubr.msk.f32.vlgmr.msra.gmra.mxu0 %vm910_vm2, %v2678_v6  ;;  %v1641_v8 = vsel %vm910_vm2, %v2678_v6, 0.0 }
 0x357   : > { %2532 = vmatpush3.msra.mxu0 %v1304_v7  ;;  %1642 = vadd.xlane.f32.xlu0 %v1641_v8 }
 0x358   : > { %2533 = vmatprep.mubr.msk.f32.mxu0 %vm2985_vm0, %v2984_v0  ;;  %2541 = vmatprep.subr.mxu0 %v2984_v0 }
 0x359   : > { %v2680_v9 = vpop.eup %2679 }
 0x35a   : > { %2529 = vmatmul.mubr.msk.f32.vlgmr.msra.gmra.mxu1 %vm910_vm2, %v2680_v9  ;;  %v1644_v11 = vsel %vm910_vm2, %v2680_v9, 0.0 }
 0x35b   : > { %2537 = vmatpush3.msra.mxu1 %v1305_v10  ;;  %1645 = vadd.xlane.f32.xlu1 %v1644_v11 }
 0x35c   : > { %2538 = vmatprep.mubr.msk.f32.mxu1 %vm2985_vm0, %v2984_v0 }
 0x35d   : > { %v2682_v12 = vpop.eup %2681 }
 0x35e   : > { %2534 = vmatmul.mubr.msk.f32.vlgmr.msra.gmra.mxu0 %vm910_vm2, %v2682_v12  ;;  %v1647_v13 = vsel %vm910_vm2, %v2682_v12, 0.0 }
 0x35f   : > { %1648 = vadd.xlane.f32.xlu0 %v1647_v13  ;;  %2549 = vmatprep.mubr.msk.f32.mxu0 %vm2985_vm0, %v2984_v0 }
 0x360   : > { %2542 = vmatpush3.msra.mxu0 %v2109_v15 }
 0x361   : > { %v2684_v26 = vpop.eup %2683  ;;  %2543 = vmatprep.subr.mxu0 %v2984_v0 }
 0x362   : > { %2539 = vmatmul.mubr.msk.f32.vlgmr.msra.gmra.mxu1 %vm910_vm2, %v2684_v26  ;;  %v1650_v14 = vsel %vm910_vm2, %v2684_v26, 0.0  ;;  %2544 = vmatpush3.msra.mxu0 %v2108_v51 }
 0x363   : > { %1651 = vadd.xlane.f32.xlu1 %v1650_v14  ;;  %2545 = vmatprep.subr.mxu0 %v2984_v0 }
 0x364   : > { %2546 = vmatpush3.msra.mxu0 %v2107_v52 }
 0x365   : > { %2547 = vmatprep.subr.mxu0 %v2984_v0 }
 0x366   : > { %2548 = vmatpush3.msra.mxu0 %v2106_v61 }
 0x3e0   : > { %v1643_v16 = vpop.xlane.xlu0 %1642 }
 0x3e4   : > { %v1646_v17 = vpop.xlane.xlu1 %1645 }
 0x3e8   : > { %v1649_v18 = vpop.xlane.xlu0 %1648 }
 0x3e9   : > { %2685 = vrcp.f32 %v1649_v18 }
 0x3ea   : > { %2687 = vrcp.f32 %v1643_v16 }
 0x3eb   : > { %2689 = vrcp.f32 %v1646_v17  ;;  %v2426_v17 = vld [vmem:[%s3571_s27] ss:$0 sm:$0xff] }
 0x3ec   : > { %v1652_v19 = vpop.xlane.xlu1 %1651 }
 0x3ed   : > { %2691 = vrcp.f32 %v1652_v19 }
 0x3f6   : > { %v2686_v24 = vpop.eup %2685 }
 0x3f7   : > { %v2688_v28 = vpop.eup %2687 }
 0x3f8   : > { %v2690_v30 = vpop.eup %2689 }
 0x3fa   : > { %v2692_v32 = vpop.eup %2691 }
 0x416   : > { %v1722_v20 = vpop.f32.mrf.mxu0 }
 0x417   : > { %v1949_v31 = vmul.f32 %v2688_v28, %v1722_v20 }
 0x418   : > { %v2525_v21 = vpop.f32.mrf.mxu0 }
 0x41a   : > { %v1795_v22 = vpop.f32.mrf.mxu1 }
 0x41b   : > { %v1950_v34 = vmul.f32 %v2690_v30, %v1795_v22 }
 0x41c   : > { %v2530_v23 = vpop.f32.mrf.mxu1 }
 0x41e   : > { %v1868_v25 = vpop.f32.mrf.mxu0 }
 0x41f   : > { %v1951_v27 = vmul.f32 %v2686_v24, %v1868_v25 }
 0x420   : > { %v2535_v29 = vpop.f32.mrf.mxu0 }
 0x421   : > { %v1953_v35 = vcombine.low %v1949_v31, %v1951_v27  ;;  %v1954_v36 = vcombine.high %v1949_v31, %v1951_v27 }
 0x422   : > { %v1941_v33 = vpop.f32.mrf.mxu1 }
 0x423   : > { %v1952_v37 = vmul.f32 %v2692_v32, %v1941_v33  ;;  %v1961_v42 = vrot.slane %v1953_v35, %v3322_v38  ;;  %v1968_v43 = vrot.slane %v1954_v36, %v3322_v38 }
 0x424   : > { %v2540_v39 = vpop.f32.mrf.mxu1 }
 0x425   : > { %v1969_v40 = vcombine.low %v1950_v34, %v1952_v37  ;;  %v1970_v41 = vcombine.high %v1950_v34, %v1952_v37 }
 0x427   : > { %v1977_v45 = vrot.slane %v1969_v40, %v3322_v38  ;;  %v1984_v46 = vrot.slane %v1970_v41, %v3322_v38 }
 0x429   : > { %v1985_v47 = vcombine.low %v1961_v42, %v1977_v45  ;;  %v1986_v48 = vcombine.high %v1961_v42, %v1977_v45  ;;  %v2001_v49 = vcombine.low %v1968_v43, %v1984_v46  ;;  %v2002_v50 = vcombine.high %v1968_v43, %v1984_v46 }
 0x42b   : > { %v1993_v53 = vrot.slane %v1985_v47, %v3324_v44  ;;  %v2000_v54 = vrot.slane %v1986_v48, %v3324_v44  ;;  %v2009_v55 = vrot.slane %v2001_v49, %v3324_v44  ;;  %v2016_v56 = vrot.slane %v2002_v50, %v3324_v44 }
 0x42d   : > { %v2021_v57 = vcombine.low %v1993_v53, %v2000_v54  ;;  %v2424_v58 = vcombine.high %v1993_v53, %v2000_v54  ;;  %v2037_v59 = vcombine.low %v2009_v55, %v2016_v56  ;;  %v2425_v60 = vcombine.high %v2009_v55, %v2016_v56 }
 0x42f   : > { %v2028_v62 = vrot.slane %v2021_v57, %v3322_v38  ;;  %v2036_v63 = vrot.slane %v2424_v58, %v3322_v38  ;;  %v2044_v1 = vrot.slane %v2037_v59, %v3322_v38  ;;  %v2052_v2 = vrot.slane %v2425_v60, %v3322_v38 }
 0x431   : > { %v2054_v3 = vcombine.high %v2028_v62, %v2036_v63  ;;  %v2070_v4 = vcombine.high %v2044_v1, %v2052_v2  ;;  %v2053_v5 = vcombine.low %v2028_v62, %v2036_v63  ;;  %v2069_v6 = vcombine.low %v2044_v1, %v2052_v2 }
 0x433   : > { %v2068_v7 = vrot.slane %v2054_v3, %v3324_v44  ;;  %v2084_v8 = vrot.slane %v2070_v4, %v3324_v44  ;;  %v2061_v0 = vrot.slane %v2053_v5, %v3324_v44  ;;  %v2077_v9 = vrot.slane %v2069_v6, %v3324_v44 }
 0x435   : > { %v2087_v10 = vcombine.low %v2068_v7, %v2084_v8  ;;  %v2086_v11 = vcombine.high %v2061_v0, %v2077_v9  ;;  %v2085_v12 = vcombine.low %v2061_v0, %v2077_v9  ;;  %v2088_v38 = vcombine.high %v2068_v7, %v2084_v8 }
 0x437   : > { %2094 = vrot.lane.b32.xlu1 %v2087_v10, %s2991_s19  ;;  %2090 = vrot.lane.b32.xlu0 %v2086_v11, %s2992_s18 }
 0x43b   : > { %2098 = vrot.lane.b32.xlu1 %v2088_v38, %s2993_s6 }
 0x4a9   : > { %v2095_v13 = vpop.permute.xlu1 %2094  ;;  %v2091_v26 = vpop.permute.xlu0 %2090 }
 0x4aa   : > { %v2101_v14 = vsel %vm910_vm2, %v2085_v12, %v2091_v26 }
 0x4ab   : > { %v2103_v15 = vsel %vm2102_vm3, %v2101_v14, %v2095_v13 }
 0x4ad   : > { %v2099_v44 = vpop.permute.xlu1 %2098 }
 0x4ae   : > { %v2105_v16 = vsel %vm2104_vm4, %v2103_v15, %v2099_v44 }
 0x4af   : > { %2550 = vmatmul.mubr.msk.f32.vlgmr.msra.gmra.mxu0 %vm606_vm1, %v2105_v16 }
 0x56f   : > { %v2186_v18 = vpop.f32.mrf.mxu0 }
 0x570   : > { %v2187_v19 = vadd.f32 %v2426_v17, %v2186_v18 }
 0x571   : > { %v2551_v20 = vpop.f32.mrf.mxu0 }
 0x572   : > { %2190 = vst.msk [vmem:[%s585_s1] sm:$0xff] %vm606_vm1, %v2187_v19 }
 0x573   : > { %2894 = shalt.err (!%p2891_p8)
}
 0x574   : > { %s2895_s13 = scalar_lea.hbm %s3459_s29, 128  ;;  %s2899_s15 = scalar_lea.hbm %s3572_s16, 256 }
 0x575   : > { %p2896_p6 = scmp.ne.s32.totalorder %s3459_s29, %s2895_s13  ;;  %p2900_p13 = scmp.lt.s32.totalorder %s3459_s29, %s3572_s16 }
 0x576   : > { %p2901_p9 = scmp.lt.s32.totalorder %s2899_s15, %s2895_s13 }
 0x577   : > { %p2897_p3 = pnand %p2896_p6, %p3573_p2 }
 0x578   : > { %p2902_p11 = por %p2901_p9, %p2900_p13 }
 0x579   : > { %p2898_p0 = pneg %p2897_p3 }
 0x57b   : > { %p2903_p12 = pnand %p2902_p11, %p2898_p0 }
 0x57d   : > { %2906 = shalt.err (!%p2903_p12)
}
 0x57e   : > { %2574 = dma.vmem_to_hbm [thread:$0]  (%p3573_p2), %s2207_s20, 128, %s3459_s29, %s2192_s21  }
 0x57f PF: > { %s3574_s6 = sld [smem:[#allocation22_spill]] }
 0x580   : > { %s3575_s12 = sld [smem:[#allocation28_spill]] }
 0x581   : > { %s3576_s28 = sld [smem:[#allocation24_spill]] }
 0x585   : > { %s2218_s27 = sand.u32 1, %s3574_s6  }
 0x586   : > { %p3577_p5 = scmp.ne.s32.totalorder %s3575_s12, 0  ;;  %s2219_s14 = scalar_lea.sflag [#allocation6], %s2218_s27 }
 0x587   : > { %p3578_p10 = scmp.ge.s32.totalorder %s3576_s28, 2 }
 0x589   : > { %p2600_p1 = pnand %p3578_p10, %p3577_p5 }
 0x58b   : > { %p2601_p7 = pneg %p2600_p1 }
 0x58d   : > { %2948 = dma.done.wait (%p2601_p7), %s2219_s14, 128  }
 0x58e   : > { %2950 = vsyncadd (%p2601_p7), %s2219_s14, 4294967168  ;;  %s33_s26 = sadd.s32 1, %s3576_s28   ;;  %s3579_s8 = sld [smem:[#allocation27_spill]] }
 0x58f   : > { %p30_p4 = scmp.ge.s32.totalorder %s33_s26, 4   ;;  %s3580_s24 = sld [smem:[#allocation23_spill]] }
 0x590   : > { %s3581_s25 = sld [smem:[#allocation25_spill]]  ;;  %s3582_s21 = smov %s2957_s22 }
 0x591   : > { %s3583_s22 = smov %s2961_s23  ;;  %32 = sbr.rel (!%p30_p4) target bundleno = 18 (0x12), region = 160 }
 0x594   : > { %s3584_s23 = smov %s3579_s8 }
 0x596   :  { %2224 = vsyncpa [#allocation5], 1 }
 0x597   :  { %2226 = vsyncpa [#allocation5 + $0x1], 1 }
 0x598   :  { %2227 = vsyncpa [#allocation8], 1 }
 0x599   :  { %2229 = vsyncpa [#allocation8 + $0x1], 1 }
 0x59a   :  { %2230 = vsyncpa [#allocation11], 1 }
 0x59b   :  { %2231 = vsyncpa [#allocation14], 1 }
 0x59c   :  { %2232 = vsyncpa [#allocation6], 1 }
 0x59d   :  { %2234 = vsyncpa [#allocation6 + $0x1], 1 }

</bundles_post_ra>
